<compile_context>
chip_gen: v7x
topology: tpu7x:2x2x1
jax: 0.10.0
libtpu: 0.0.40
codegen_flags: <defaults>
</compile_context>

<pallas_src>
import functools

import jax
import jax.numpy as jnp
from jax import lax
from jax.experimental import pallas as pl
from jax.experimental.pallas import tpu as pltpu


def sa_layer_kernel(x_ref, m_ref, wv_ref, bv_ref, wt_ref, bt_ref,
                    out_ref, attn_ref,
                    acc_s, colsum_s, stash_s=None,
                    *, tq, approx_recip, compute_dtype, exp_dtype):
    ph = pl.program_id(1)            # 0: accumulate, 1: emit attn / out tiles
    t = pl.program_id(2)             # row / column tile index
    f32 = jnp.float32
    cdt = compute_dtype

    n_full = x_ref.shape[2]
    single_tile = (tq == n_full)     # static (trace-time) decision
    if single_tile:
        sl = slice(None)             # no dynamic slicing needed
    else:
        sl = pl.ds(pl.multiple_of(t * tq, tq), tq)   # 128-aligned tile slice

    x_cols = x_ref[0, :, sl]                                      # (C, TQ) f32

    def softmax_slab():
        # energy rows via the fused (symmetric) Gram matrix M = Wq^T Wq:
        #   energy[n, m] = x[:, n]^T M x[:, m]
        a = lax.dot_general(x_cols.astype(cdt), m_ref[...],
                            dimension_numbers=(((0,), (0,)), ((), ())),
                            preferred_element_type=f32)           # (TQ, C)
        energy = lax.dot_general(a.astype(cdt), x_ref[0].astype(cdt),
                                 dimension_numbers=(((1,), (0,)), ((), ())),
                                 preferred_element_type=f32)      # (TQ, N)
        e_max = jnp.max(energy, axis=-1, keepdims=True)
        p = jnp.exp((energy - e_max).astype(exp_dtype))
        inv_row = pl.reciprocal(jnp.sum(p.astype(f32), axis=-1, keepdims=True),
                                approx=approx_recip)
        return p * inv_row.astype(p.dtype)                        # row softmax

    # ---- phase 0: accumulate column sums and x_v @ softmax -------------------
    @pl.when((ph == 0) & (t == 0))
    def _init():
        acc_s[...] = jnp.zeros_like(acc_s)
        colsum_s[...] = jnp.zeros_like(colsum_s)

    @pl.when(ph == 0)
    def _accumulate():
        sm = softmax_slab()
        colsum_s[...] += jnp.sum(sm.astype(f32), axis=0, keepdims=True)
        if stash_s is not None:
            # stash the unnormalized softmax slab -> no phase-1 recompute
            stash_s[sl, :] = sm.astype(stash_s.dtype)
        v_cols = jnp.dot(wv_ref[...], x_cols,
                         preferred_element_type=f32) + bv_ref[...]  # (C, TQ)
        acc_s[...] += lax.dot_general(v_cols.astype(cdt), sm.astype(cdt),
                                      dimension_numbers=(((1,), (0,)), ((), ())),
                                      preferred_element_type=f32)

    # ---- phase 1: column renormalization + streamed writebacks ---------------
    @pl.when((ph == 1) & (t == 0))
    def _finalize_colsum():
        # torch: attention / (1e-9 + attention.sum(dim=1)); keep the reciprocal.
        colsum_s[...] = pl.reciprocal(colsum_s[...] + 1e-9, approx=approx_recip)

    @pl.when(ph == 1)
    def _emit():
        inv_col = colsum_s[...]                                    # (1, N)
        sm = stash_s[sl, :] if stash_s is not None else softmax_slab()
        attn_ref[0] = (sm * inv_col.astype(sm.dtype)).astype(attn_ref.dtype)

        # streamed output column tile: out = x + LeakyReLU(BN(trans(x - x_r)))
        inv_col_t = colsum_s[:, sl]                                # (1, TQ)
        x_r_cols = acc_s[:, sl] * inv_col_t                        # (C, TQ)
        tt = jnp.dot(wt_ref[...], x_cols - x_r_cols,
                     preferred_element_type=f32) + bt_ref[...]
        act = jnp.where(tt >= 0, tt, 0.1 * tt)                     # LeakyReLU(0.1)
        out_ref[0] = (x_cols + act).astype(out_ref.dtype)


def _pick_row_tile(n):
    for cand in (256, 128):
        if n % cand == 0:
            return cand
    return n    # ragged / small N: single full-height tile


def _bf16_eup_ok():
    # v2-v5 VPUs/EUPs have no native bf16; v6e / v7x do.
    try:
        kind = jax.devices()[0].device_kind.lower()
    except Exception:
        return True
    return not any(tag in kind for tag in ("v2", "v3", "v4", "v5"))


def _vmem_capacity_bytes():
    try:
        return int(pltpu.get_tpu_info().vmem_capacity_bytes)
    except Exception:
        return 64 << 20     # conservative: v7x per-core VMEM


def sa_layer(x, params, *, row_tile=None, fast=True, attn_dtype=None,
             stash_softmax=None):
    """x: (B, C, N). params: SA_Layer weights (BatchNorm in eval mode).

    fast=True : bf16 MXU operands / exponent (bf16-EUP chips) / attn output +
                approximate reciprocals.
    fast=False: plain f32 path (closely matches the PyTorch forward).
    Returns (out, attention) like SA_Layer.forward.
    """
    x = x.astype(jnp.float32)
    B, C, N = x.shape
    tq = row_tile if row_tile is not None else _pick_row_tile(N)
    assert N % tq == 0 and (tq % 128 == 0 or tq == N), (N, tq)
    nt = N // tq

    f32 = jnp.float32
    compute_dtype = jnp.bfloat16 if fast else f32
    exp_dtype = jnp.bfloat16 if (fast and _bf16_eup_ok()) else f32
    stash_dtype = jnp.bfloat16 if fast else f32
    if attn_dtype is None:
        attn_dtype = jnp.bfloat16 if fast else f32

    # Fused shared q/k projection: energy = x^T (Wq^T Wq) x (symmetric Gram).
    wqk = params["wqk"].astype(f32)                               # (C//4, C)
    m = jnp.dot(wqk.T, wqk).astype(compute_dtype)                 # (C, C)
    wv = params["wv"].astype(f32)                                 # (C, C)
    bv = params["bv"].astype(f32).reshape(C, 1)
    # Fold eval-mode BatchNorm1d into trans_conv: BN(W y + b) = W' y + b'.
    scale = params["gamma"].astype(f32) * lax.rsqrt(params["var"].astype(f32) + 1e-5)
    wt_f = scale[:, None] * params["wt"].astype(f32)              # (C, C)
    bt_f = (scale * (params["bt"].astype(f32) - params["mean"].astype(f32))
            + params["beta"].astype(f32)).reshape(C, 1)           # (C, 1)

    # VMEM working set: double-buffered pipeline blocks + persistent scratch.
    attn_itm = jnp.dtype(attn_dtype).itemsize
    fixed = (2 * C * N * 4                      # x block
             + 2 * C * tq * 4                   # out column tile
             + 2 * tq * N * attn_itm            # attn row slab
             + 2 * (3 * C * C + 2 * C) * 4      # weights / biases
             + C * N * 4 + N * 4)               # x_r accumulator + column sums
    stash_bytes = N * N * jnp.dtype(stash_dtype).itemsize
    vmem_cap = _vmem_capacity_bytes()
    if stash_softmax is None:
        # Keep the unnormalized softmax resident in VMEM when it fits; otherwise
        # fall back to recomputing the (TQ, N) slab in phase 1.
        stash_softmax = (fixed + stash_bytes) <= int(0.6 * vmem_cap)
    working = fixed + (stash_bytes if stash_softmax else 0)
    vmem_limit = int(min(0.9 * vmem_cap, max(32 << 20, working + (8 << 20))))

    scratch = [pltpu.VMEM((C, N), f32),         # x_r accumulator
               pltpu.VMEM((1, N), f32)]         # column sums -> reciprocal
    if stash_softmax:
        scratch.append(pltpu.VMEM((N, N), stash_dtype))   # unnormalized softmax

    kernel = functools.partial(sa_layer_kernel, tq=tq, approx_recip=fast,
                               compute_dtype=compute_dtype, exp_dtype=exp_dtype)

    out, attn = pl.pallas_call(
        kernel,
        out_shape=(
            jax.ShapeDtypeStruct((B, C, N), x.dtype),
            jax.ShapeDtypeStruct((B, N, N), attn_dtype),
        ),
        grid_spec=pltpu.PrefetchScalarGridSpec(
            num_scalar_prefetch=0,
            grid=(B, 2, nt),
            in_specs=[
                pl.BlockSpec((1, C, N), lambda b, ph, t: (b, 0, 0)),   # x
                pl.BlockSpec((C, C), lambda b, ph, t: (0, 0)),         # M = Wq^T Wq
                pl.BlockSpec((C, C), lambda b, ph, t: (0, 0)),         # wv
                pl.BlockSpec((C, 1), lambda b, ph, t: (0, 0)),         # bv
                pl.BlockSpec((C, C), lambda b, ph, t: (0, 0)),         # wt (BN folded)
                pl.BlockSpec((C, 1), lambda b, ph, t: (0, 0)),         # bt (BN folded)
            ],
            out_specs=[
                # Both outputs are written only in phase 1. During phase 0 the
                # index is held at block 0, so each block has a single residence
                # and is fully written at (ph=1, t) before its one writeback
                # (writeback happens only on block-index change / grid end).
                pl.BlockSpec((1, C, tq), lambda b, ph, t: (b, 0, ph * t)),  # out
                pl.BlockSpec((1, tq, N), lambda b, ph, t: (b, ph * t, 0)),  # attn
            ],
            scratch_shapes=scratch,
        ),
        compiler_params=pltpu.CompilerParams(
            dimension_semantics=("parallel", "arbitrary", "arbitrary"),
            vmem_limit_bytes=vmem_limit,
        ),
    )(x, m, wv, bv, wt_f, bt_f)
    return out, attn


def sa_layer_reference(x, params):
    """Pure-JAX reference mirroring the PyTorch forward (BN in eval mode)."""
    wqk, wv, bv = params["wqk"], params["wv"], params["bv"]
    wt, bt = params["wt"], params["bt"]
    gamma, beta, mean, var = params["gamma"], params["beta"], params["mean"], params["var"]

    qk = jnp.einsum("oc,bcn->bon", wqk, x)                      # (B, C4, N)
    x_q = jnp.transpose(qk, (0, 2, 1))                          # (B, N, C4)
    x_k = qk
    x_v = jnp.einsum("oc,bcn->bon", wv, x) + bv[None, :, None]
    energy = jnp.einsum("bnc,bcm->bnm", x_q, x_k)
    attn = jax.nn.softmax(energy, axis=-1)
    attn = attn / (1e-9 + jnp.sum(attn, axis=1, keepdims=True))
    x_r = jnp.einsum("bcn,bnm->bcm", x_v, attn)
    t = jnp.einsum("oc,bcn->bon", wt, x - x_r) + bt[None, :, None]
    bn = (t - mean[None, :, None]) / jnp.sqrt(var[None, :, None] + 1e-5) \
         * gamma[None, :, None] + beta[None, :, None]
    act = jnp.where(bn >= 0, bn, 0.1 * bn)
    return x + act, attn


if __name__ == "__main__":
    B, C, N = 2, 16, 256         # channels=16 -> q/k dim 4, 256 points
    TQ = 128                     # 2 row/column tiles per batch (exercises tiling)

    key = jax.random.PRNGKey(0)
    ks = jax.random.split(key, 10)
    x = jax.random.normal(ks[0], (B, C, N), dtype=jnp.float32)

    params = {
        "wqk":   0.2 * jax.random.normal(ks[1], (C // 4, C), dtype=jnp.float32),
        "wv":    0.2 * jax.random.normal(ks[2], (C, C), dtype=jnp.float32),
        "bv":    0.1 * jax.random.normal(ks[3], (C,), dtype=jnp.float32),
        "wt":    0.2 * jax.random.normal(ks[4], (C, C), dtype=jnp.float32),
        "bt":    0.1 * jax.random.normal(ks[5], (C,), dtype=jnp.float32),
        "gamma": 1.0 + 0.1 * jax.random.normal(ks[6], (C,), dtype=jnp.float32),
        "beta":  0.1 * jax.random.normal(ks[7], (C,), dtype=jnp.float32),
        "mean":  0.1 * jax.random.normal(ks[8], (C,), dtype=jnp.float32),
        "var":   1.0 + 0.1 * jax.nn.softplus(jax.random.normal(ks[9], (C,), dtype=jnp.float32)),
    }

    out_gold, attn_gold = sa_layer_reference(x, params)

    # 1) exact path with the VMEM softmax stash (f32, exact reciprocals).
    out, attn = sa_layer(x, params, row_tile=TQ, fast=False)
    jax.block_until_ready((out, attn))
    assert jnp.allclose(out, out_gold, atol=1e-4, rtol=1e-4), "output mismatch (exact, stash)"
    assert jnp.allclose(attn, attn_gold, atol=1e-4, rtol=1e-4), "attention mismatch (exact, stash)"

    # 2) exact path exercising the recompute fallback (no VMEM stash).
    out_n, attn_n = sa_layer(x, params, row_tile=TQ, fast=False, stash_softmax=False)
    jax.block_until_ready((out_n, attn_n))
    assert jnp.allclose(out_n, out_gold, atol=1e-4, rtol=1e-4), "output mismatch (exact, recompute)"
    assert jnp.allclose(attn_n, attn_gold, atol=1e-4, rtol=1e-4), "attention mismatch (exact, recompute)"

    # 3) fast path: bf16 MXU / exp / attn output + approx reciprocals.
    out_f, attn_f = sa_layer(x, params, row_tile=TQ, fast=True)
    jax.block_until_ready((out_f, attn_f))

    def rel_err(a, b):
        a = a.astype(jnp.float32)
        b = b.astype(jnp.float32)
        return float(jnp.linalg.norm((a - b).ravel()) /
                     (jnp.linalg.norm(b.ravel()) + 1e-12))

    assert rel_err(out_f, out_gold) < 5e-2, "output mismatch (fast path)"
    assert rel_err(attn_f, attn_gold) < 5e-2, "attention mismatch (fast path)"

    print("KERNEL_OK")
</pallas_src>

<mosaic_0001>
module attributes {stable_mosaic.version = 11 : i64} {
  func.func @sa_layer_kernel(%arg0: i32, %arg1: i32, %arg2: i32, %arg3: memref<1x16x256xf32, #tpu.memory_space<vmem>>, %arg4: memref<16x16xf32, #tpu.memory_space<vmem>>, %arg5: memref<16x16xf32, #tpu.memory_space<vmem>>, %arg6: memref<16x1xf32, #tpu.memory_space<vmem>>, %arg7: memref<16x16xf32, #tpu.memory_space<vmem>>, %arg8: memref<16x1xf32, #tpu.memory_space<vmem>>, %arg9: memref<1x16x128xf32, #tpu.memory_space<vmem>>, %arg10: memref<1x128x256xf32, #tpu.memory_space<vmem>>, %arg11: memref<16x256xf32, #tpu.memory_space<vmem>>, %arg12: memref<1x256xf32, #tpu.memory_space<vmem>>, %arg13: memref<256x256xf32, #tpu.memory_space<vmem>>) attributes {dimension_semantics = [#tpu.dimension_semantics<parallel>, #tpu.dimension_semantics<arbitrary>, #tpu.dimension_semantics<arbitrary>], iteration_bounds = array<i64: 2, 2, 2>, scalar_prefetch = 0 : i64, scratch_operands = 3 : i64, tpu.core_type = #tpu.core_type<tc>, window_params = [{transform_indices = @transform_0, window_bounds = array<i64: 1, 16, 256>}, {pipeline_mode = #tpu.pipeline_mode<synchronous>, transform_indices = @transform_1, window_bounds = array<i64: 16, 16>}, {pipeline_mode = #tpu.pipeline_mode<synchronous>, transform_indices = @transform_2, window_bounds = array<i64: 16, 16>}, {pipeline_mode = #tpu.pipeline_mode<synchronous>, transform_indices = @transform_3, window_bounds = array<i64: 16, 1>}, {pipeline_mode = #tpu.pipeline_mode<synchronous>, transform_indices = @transform_4, window_bounds = array<i64: 16, 16>}, {pipeline_mode = #tpu.pipeline_mode<synchronous>, transform_indices = @transform_5, window_bounds = array<i64: 16, 1>}, {transform_indices = @transform_6, window_bounds = array<i64: 1, 16, 128>}, {transform_indices = @transform_7, window_bounds = array<i64: 1, 128, 256>}]} {
    %c128_i32 = arith.constant 128 : i32
    %0 = arith.muli %arg2, %c128_i32 : i32
    %1 = tpu.assume_multiple %0, 128 : i32
    %c0 = arith.constant 0 : index
    %c0_0 = arith.constant 0 : index
    %2 = arith.index_cast %1 : i32 to index
    %3 = vector.load %arg3[%c0, %c0_0, %2] : memref<1x16x256xf32, #tpu.memory_space<vmem>>, vector<1x16x128xf32>
    %4 = vector.shape_cast %3 : vector<1x16x128xf32> to vector<16x128xf32>
    %c0_i32 = arith.constant 0 : i32
    %5 = arith.cmpi eq, %arg1, %c0_i32 : i32
    %c0_i32_1 = arith.constant 0 : i32
    %6 = arith.cmpi eq, %arg2, %c0_i32_1 : i32
    %7 = arith.andi %5, %6 : i1
    %8 = arith.extui %7 : i1 to i32
    %c0_i32_2 = arith.constant 0 : i32
    %9 = arith.cmpi ne, %8, %c0_i32_2 : i32
    scf.if %9 {
      %cst = arith.constant 0.000000e+00 : f32
      %21 = vector.broadcast %cst : f32 to vector<16x256xf32>
      %c0_9 = arith.constant 0 : index
      %c0_10 = arith.constant 0 : index
      %22 = vector.load %arg11[%c0_9, %c0_10] : memref<16x256xf32, #tpu.memory_space<vmem>>, vector<16x256xf32>
      tpu.vector_store %arg11[%c0_9, %c0_10], %21 {strides = array<i32>} : memref<16x256xf32, #tpu.memory_space<vmem>>, vector<16x256xf32>,
      %cst_11 = arith.constant 0.000000e+00 : f32
      %23 = vector.broadcast %cst_11 : f32 to vector<1x256xf32>
      %c0_12 = arith.constant 0 : index
      %c0_13 = arith.constant 0 : index
      %24 = vector.load %arg12[%c0_12, %c0_13] : memref<1x256xf32, #tpu.memory_space<vmem>>, vector<1x256xf32>
      tpu.vector_store %arg12[%c0_12, %c0_13], %23 {strides = array<i32>} : memref<1x256xf32, #tpu.memory_space<vmem>>, vector<1x256xf32>,
    } else {
    }
    %c0_i32_3 = arith.constant 0 : i32
    %10 = arith.cmpi eq, %arg1, %c0_i32_3 : i32
    %11 = arith.extui %10 : i1 to i32
    %c0_i32_4 = arith.constant 0 : i32
    %12 = arith.cmpi ne, %11, %c0_i32_4 : i32
    scf.if %12 {
      %c0_9 = arith.constant 0 : index
      %c0_10 = arith.constant 0 : index
      %21 = vector.load %arg4[%c0_9, %c0_10] : memref<16x16xf32, #tpu.memory_space<vmem>>, vector<16x16xf32>
      %cst = arith.constant dense<0.000000e+00> : vector<128x16xf32>
      %22 = tpu.matmul %4, %21, %cst {dimension_numbers = #tpu.dot_dimension_numbers<[0], [0], [1], [1], [0, 1, 1, 1], [], []>} : vector<16x128xf32>, vector<16x16xf32>, vector<128x16xf32> -> vector<128x16xf32>
      %c0_11 = arith.constant 0 : index
      %c0_12 = arith.constant 0 : index
      %c0_13 = arith.constant 0 : index
      %23 = vector.load %arg3[%c0_11, %c0_12, %c0_13] : memref<1x16x256xf32, #tpu.memory_space<vmem>>, vector<1x16x256xf32>
      %24 = vector.shape_cast %23 : vector<1x16x256xf32> to vector<16x256xf32>
      %cst_14 = arith.constant dense<0.000000e+00> : vector<128x256xf32>
      %25 = tpu.matmul %22, %24, %cst_14 {dimension_numbers = #tpu.dot_dimension_numbers<[1], [0], [0], [1], [0, 0, 1, 1], [], []>} : vector<128x16xf32>, vector<16x256xf32>, vector<128x256xf32> -> vector<128x256xf32>
      %cst_15 = arith.constant dense<0xFF800000> : vector<128xf32>
      %26 = vector.multi_reduction <maximumf>, %25, %cst_15 [1] : vector<128x256xf32> to vector<128xf32>
      %27 = vector.shape_cast %26 : vector<128xf32> to vector<128x1xf32>
      %28 = vector.broadcast %27 : vector<128x1xf32> to vector<128x256xf32>
      %29 = arith.subf %25, %28 : vector<128x256xf32>
      %30 = math.exp %29 : vector<128x256xf32>
      %cst_16 = arith.constant dense<0.000000e+00> : vector<128xf32>
      %31 = vector.multi_reduction <add>, %30, %cst_16 [1] : vector<128x256xf32> to vector<128xf32>
      %32 = vector.shape_cast %31 : vector<128xf32> to vector<128x1xf32>
      %33 = tpu.reciprocal %32 : vector<128x1xf32> -> vector<128x1xf32>
      %34 = vector.broadcast %33 : vector<128x1xf32> to vector<128x256xf32>
      %35 = arith.mulf %30, %34 : vector<128x256xf32>
      %c0_17 = arith.constant 0 : index
      %c0_18 = arith.constant 0 : index
      %36 = vector.load %arg12[%c0_17, %c0_18] : memref<1x256xf32, #tpu.memory_space<vmem>>, vector<1x256xf32>
      %cst_19 = arith.constant dense<0.000000e+00> : vector<256xf32>
      %37 = vector.multi_reduction <add>, %35, %cst_19 [0] : vector<128x256xf32> to vector<256xf32>
      %38 = vector.shape_cast %37 : vector<256xf32> to vector<1x256xf32>
      %39 = arith.addf %36, %38 : vector<1x256xf32>
      %c0_20 = arith.constant 0 : index
      %c0_21 = arith.constant 0 : index
      %40 = vector.load %arg12[%c0_20, %c0_21] : memref<1x256xf32, #tpu.memory_space<vmem>>, vector<1x256xf32>
      tpu.vector_store %arg12[%c0_20, %c0_21], %39 {strides = array<i32>} : memref<1x256xf32, #tpu.memory_space<vmem>>, vector<1x256xf32>,
      %41 = arith.index_cast %1 : i32 to index
      %c0_22 = arith.constant 0 : index
      %42 = vector.load %arg13[%41, %c0_22] : memref<256x256xf32, #tpu.memory_space<vmem>>, vector<128x256xf32>
      tpu.vector_store %arg13[%41, %c0_22], %35 {strides = array<i32>} : memref<256x256xf32, #tpu.memory_space<vmem>>, vector<128x256xf32>,
      %c0_23 = arith.constant 0 : index
      %c0_24 = arith.constant 0 : index
      %43 = vector.load %arg5[%c0_23, %c0_24] : memref<16x16xf32, #tpu.memory_space<vmem>>, vector<16x16xf32>
      %cst_25 = arith.constant dense<0.000000e+00> : vector<16x128xf32>
      %44 = tpu.matmul %43, %4, %cst_25 {dimension_numbers = #tpu.dot_dimension_numbers<[1], [0], [0], [1], [0, 0, 1, 1], [], []>} : vector<16x16xf32>, vector<16x128xf32>, vector<16x128xf32> -> vector<16x128xf32>
      %c0_26 = arith.constant 0 : index
      %c0_27 = arith.constant 0 : index
      %45 = vector.load %arg6[%c0_26, %c0_27] : memref<16x1xf32, #tpu.memory_space<vmem>>, vector<16x1xf32>
      %46 = vector.broadcast %45 : vector<16x1xf32> to vector<16x128xf32>
      %47 = arith.addf %44, %46 : vector<16x128xf32>
      %c0_28 = arith.constant 0 : index
      %c0_29 = arith.constant 0 : index
      %48 = vector.load %arg11[%c0_28, %c0_29] : memref<16x256xf32, #tpu.memory_space<vmem>>, vector<16x256xf32>
      %cst_30 = arith.constant dense<0.000000e+00> : vector<16x256xf32>
      %49 = tpu.matmul %47, %35, %cst_30 {dimension_numbers = #tpu.dot_dimension_numbers<[1], [0], [0], [1], [0, 0, 1, 1], [], []>} : vector<16x128xf32>, vector<128x256xf32>, vector<16x256xf32> -> vector<16x256xf32>
      %50 = arith.addf %48, %49 : vector<16x256xf32>
      %c0_31 = arith.constant 0 : index
      %c0_32 = arith.constant 0 : index
      %51 = vector.load %arg11[%c0_31, %c0_32] : memref<16x256xf32, #tpu.memory_space<vmem>>, vector<16x256xf32>
      tpu.vector_store %arg11[%c0_31, %c0_32], %50 {strides = array<i32>} : memref<16x256xf32, #tpu.memory_space<vmem>>, vector<16x256xf32>,
    } else {
    }
    %c1_i32 = arith.constant 1 : i32
    %13 = arith.cmpi eq, %arg1, %c1_i32 : i32
    %c0_i32_5 = arith.constant 0 : i32
    %14 = arith.cmpi eq, %arg2, %c0_i32_5 : i32
    %15 = arith.andi %13, %14 : i1
    %16 = arith.extui %15 : i1 to i32
    %c0_i32_6 = arith.constant 0 : i32
    %17 = arith.cmpi ne, %16, %c0_i32_6 : i32
    scf.if %17 {
      %c0_9 = arith.constant 0 : index
      %c0_10 = arith.constant 0 : index
      %21 = vector.load %arg12[%c0_9, %c0_10] : memref<1x256xf32, #tpu.memory_space<vmem>>, vector<1x256xf32>
      %cst = arith.constant 9.99999971E-10 : f32
      %22 = vector.broadcast %cst : f32 to vector<1x256xf32>
      %23 = arith.addf %21, %22 : vector<1x256xf32>
      %24 = tpu.reciprocal %23 : vector<1x256xf32> -> vector<1x256xf32>
      %c0_11 = arith.constant 0 : index
      %c0_12 = arith.constant 0 : index
      %25 = vector.load %arg12[%c0_11, %c0_12] : memref<1x256xf32, #tpu.memory_space<vmem>>, vector<1x256xf32>
      tpu.vector_store %arg12[%c0_11, %c0_12], %24 {strides = array<i32>} : memref<1x256xf32, #tpu.memory_space<vmem>>, vector<1x256xf32>,
    } else {
    }
    %c1_i32_7 = arith.constant 1 : i32
    %18 = arith.cmpi eq, %arg1, %c1_i32_7 : i32
    %19 = arith.extui %18 : i1 to i32
    %c0_i32_8 = arith.constant 0 : i32
    %20 = arith.cmpi ne, %19, %c0_i32_8 : i32
    scf.if %20 {
      %c0_9 = arith.constant 0 : index
      %c0_10 = arith.constant 0 : index
      %21 = vector.load %arg12[%c0_9, %c0_10] : memref<1x256xf32, #tpu.memory_space<vmem>>, vector<1x256xf32>
      %22 = arith.index_cast %1 : i32 to index
      %c0_11 = arith.constant 0 : index
      %23 = vector.load %arg13[%22, %c0_11] : memref<256x256xf32, #tpu.memory_space<vmem>>, vector<128x256xf32>
      %24 = vector.broadcast %21 : vector<1x256xf32> to vector<128x256xf32>
      %25 = arith.mulf %23, %24 : vector<128x256xf32>
      %c0_12 = arith.constant 0 : index
      %c0_13 = arith.constant 0 : index
      %c0_14 = arith.constant 0 : index
      %26 = vector.load %arg10[%c0_12, %c0_13, %c0_14] : memref<1x128x256xf32, #tpu.memory_space<vmem>>, vector<1x128x256xf32>
      %27 = vector.shape_cast %26 : vector<1x128x256xf32> to vector<128x256xf32>
      %28 = vector.shape_cast %25 : vector<128x256xf32> to vector<1x128x256xf32>
      tpu.vector_store %arg10[%c0_12, %c0_13, %c0_14], %28 {strides = array<i32>} : memref<1x128x256xf32, #tpu.memory_space<vmem>>, vector<1x128x256xf32>,
      %c0_15 = arith.constant 0 : index
      %29 = arith.index_cast %1 : i32 to index
      %30 = vector.load %arg12[%c0_15, %29] : memref<1x256xf32, #tpu.memory_space<vmem>>, vector<1x128xf32>
      %c0_16 = arith.constant 0 : index
      %31 = arith.index_cast %1 : i32 to index
      %32 = vector.load %arg11[%c0_16, %31] : memref<16x256xf32, #tpu.memory_space<vmem>>, vector<16x128xf32>
      %33 = vector.broadcast %30 : vector<1x128xf32> to vector<16x128xf32>
      %34 = arith.mulf %32, %33 : vector<16x128xf32>
      %c0_17 = arith.constant 0 : index
      %c0_18 = arith.constant 0 : index
      %35 = vector.load %arg7[%c0_17, %c0_18] : memref<16x16xf32, #tpu.memory_space<vmem>>, vector<16x16xf32>
      %36 = arith.subf %4, %34 : vector<16x128xf32>
      %cst = arith.constant dense<0.000000e+00> : vector<16x128xf32>
      %37 = tpu.matmul %35, %36, %cst {dimension_numbers = #tpu.dot_dimension_numbers<[1], [0], [0], [1], [0, 0, 1, 1], [], []>} : vector<16x16xf32>, vector<16x128xf32>, vector<16x128xf32> -> vector<16x128xf32>
      %c0_19 = arith.constant 0 : index
      %c0_20 = arith.constant 0 : index
      %38 = vector.load %arg8[%c0_19, %c0_20] : memref<16x1xf32, #tpu.memory_space<vmem>>, vector<16x1xf32>
      %39 = vector.broadcast %38 : vector<16x1xf32> to vector<16x128xf32>
      %40 = arith.addf %37, %39 : vector<16x128xf32>
      %cst_21 = arith.constant 0.000000e+00 : f32
      %41 = vector.broadcast %cst_21 : f32 to vector<16x128xf32>
      %42 = arith.cmpf oge, %40, %41 : vector<16x128xf32>
      %cst_22 = arith.constant 1.000000e-01 : f32
      %43 = vector.broadcast %cst_22 : f32 to vector<16x128xf32>
      %44 = arith.mulf %43, %40 : vector<16x128xf32>
      %45 = arith.select %42, %40, %44 : vector<16x128xi1>, vector<16x128xf32>
      %46 = arith.addf %4, %45 : vector<16x128xf32>
      %c0_23 = arith.constant 0 : index
      %c0_24 = arith.constant 0 : index
      %c0_25 = arith.constant 0 : index
      %47 = vector.load %arg9[%c0_23, %c0_24, %c0_25] : memref<1x16x128xf32, #tpu.memory_space<vmem>>, vector<1x16x128xf32>
      %48 = vector.shape_cast %47 : vector<1x16x128xf32> to vector<16x128xf32>
      %49 = vector.shape_cast %46 : vector<16x128xf32> to vector<1x16x128xf32>
      tpu.vector_store %arg9[%c0_23, %c0_24, %c0_25], %49 {strides = array<i32>} : memref<1x16x128xf32, #tpu.memory_space<vmem>>, vector<1x16x128xf32>,
    } else {
    }
    return
  }
  func.func @transform_0(%arg0: i32, %arg1: i32, %arg2: i32) -> (i32, i32, i32) {
    %c0_i32 = arith.constant 0 : i32
    %c0_i32_0 = arith.constant 0 : i32
    %c0_i32_1 = arith.constant 0 : i32
    return %arg0, %c0_i32, %c0_i32_0 : i32, i32, i32
  }
  func.func @transform_1(%arg0: i32, %arg1: i32, %arg2: i32) -> (i32, i32) {
    %c0_i32 = arith.constant 0 : i32
    %c0_i32_0 = arith.constant 0 : i32
    %c0_i32_1 = arith.constant 0 : i32
    return %c0_i32, %c0_i32_0 : i32, i32
  }
  func.func @transform_2(%arg0: i32, %arg1: i32, %arg2: i32) -> (i32, i32) {
    %c0_i32 = arith.constant 0 : i32
    %c0_i32_0 = arith.constant 0 : i32
    %c0_i32_1 = arith.constant 0 : i32
    return %c0_i32, %c0_i32_0 : i32, i32
  }
  func.func @transform_3(%arg0: i32, %arg1: i32, %arg2: i32) -> (i32, i32) {
    %c0_i32 = arith.constant 0 : i32
    %c0_i32_0 = arith.constant 0 : i32
    %c0_i32_1 = arith.constant 0 : i32
    return %c0_i32, %c0_i32_0 : i32, i32
  }
  func.func @transform_4(%arg0: i32, %arg1: i32, %arg2: i32) -> (i32, i32) {
    %c0_i32 = arith.constant 0 : i32
    %c0_i32_0 = arith.constant 0 : i32
    %c0_i32_1 = arith.constant 0 : i32
    return %c0_i32, %c0_i32_0 : i32, i32
  }
  func.func @transform_5(%arg0: i32, %arg1: i32, %arg2: i32) -> (i32, i32) {
    %c0_i32 = arith.constant 0 : i32
    %c0_i32_0 = arith.constant 0 : i32
    %c0_i32_1 = arith.constant 0 : i32
    return %c0_i32, %c0_i32_0 : i32, i32
  }
  func.func @transform_6(%arg0: i32, %arg1: i32, %arg2: i32) -> (i32, i32, i32) {
    %0 = arith.muli %arg1, %arg2 : i32
    %c0_i32 = arith.constant 0 : i32
    %c0_i32_0 = arith.constant 0 : i32
    return %arg0, %c0_i32, %0 : i32, i32, i32
  }
  func.func @transform_7(%arg0: i32, %arg1: i32, %arg2: i32) -> (i32, i32, i32) {
    %0 = arith.muli %arg1, %arg2 : i32
    %c0_i32 = arith.constant 0 : i32
    %c0_i32_0 = arith.constant 0 : i32
    return %arg0, %0, %c0_i32 : i32, i32, i32
  }
}

</mosaic_0001>

<bundles_post_ra>
// kernel: tpu_custom_call.1
= control target key start
LH: loop header
LB: loop body
LE: loop exit
PB: predicated region body
PF: predicated region fallthrough
CT: control target
= control target key end

     0   :  { %s3296_s0 = inlined_call_operand.hbm [shape: f32[2,16,256], index: 0, kind: input, shape index: {}]   ;;  %s3297_s1 = inlined_call_operand.vmem [shape: f32[16,16], index: 1, kind: input, shape index: {}]   ;;  %s3298_s2 = inlined_call_operand.vmem [shape: f32[16,16], index: 2, kind: input, shape index: {}]   ;;  %s3299_s3 = inlined_call_operand.vmem [shape: f32[16,1], index: 3, kind: input, shape index: {}]   ;;  %s3300_s4 = inlined_call_operand.vmem [shape: f32[16,16], index: 4, kind: input, shape index: {}]   ;;  %s3301_s5 = inlined_call_operand.vmem [shape: f32[16,1], index: 5, kind: input, shape index: {}]   ;;  %s3302_s6 = inlined_call_operand.hbm [shape: f32[2,16,256], index: 6, kind: output, shape index: {0}]   ;;  %s3303_s7 = inlined_call_operand.hbm [shape: f32[2,256,256], index: 7, kind: output, shape index: {1}]  }
   0x1   :  { %3314 = sst [smem:[#allocation20_spill]] %s3296_s0 }
   0x2   :  { %3315 = sst [smem:[#allocation21_spill]] %s3297_s1 }
   0x3   :  { %3316 = sst [smem:[#allocation22_spill]] %s3298_s2 }
   0x4   :  { %3317 = sst [smem:[#allocation23_spill]] %s3299_s3 }
   0x5   :  { %3318 = sst [smem:[#allocation24_spill]] %s3300_s4 }
   0x6   :  { %3319 = sst [smem:[#allocation25_spill]] %s3301_s5 }
   0x7   :  { %3320 = sst [smem:[#allocation26_spill]] %s3302_s6 }
   0x8   :  { %3321 = sst [smem:[#allocation27_spill]] %s3303_s7 }
   0x9   :  { %13 = vsyncpa [#allocation6], 0 }
   0xa   :  { %15 = vsyncpa [#allocation6 + $0x1], 0 }
   0xb   :  { %16 = vsyncpa [#allocation7], 0 }
   0xc   :  { %18 = vsyncpa [#allocation7 + $0x1], 0 }
   0xd   :  { %19 = vsyncpa [#allocation10], 0 }
   0xe   :  { %21 = vsyncpa [#allocation10 + $0x1], 0  ;;  %s2440_s24 = smov 0   ;;  %s2442_s25 = smov 0  }
   0xf   :  { %s2444_s26 = smov 0   ;;  %s2446_s27 = smov 0  }
  0x10   :  { %s2448_s28 = smov 0   ;;  %s2450_s29 = smov 0  }
  0x11   :  { %s2452_s30 = smov 0   ;;  %s2454_s8 = smov 0  }
  0x12   :  { %s2456_s9 = smov 0   ;;  %s2458_s10 = smov 0  }
  0x13   :  { %s2460_s11 = smov 0   ;;  %s2462_s12 = smov 0  }
  0x14   :  { %s2464_s13 = smov 0  }
  0x15 LB: > { %3322 = sst [smem:[#allocation14_spill]] %s2336_s24  ;;  %s1760_s14 = sadd.s32 4294967295, %s2384_s13   ;;  %s2384_s13 = sphi %s2464_s13, %s27_s13   ;;  %s2380_s12 = sphi %s2462_s12, %s3358_s12   ;;  %s2376_s11 = sphi %s2460_s11, %s3349_s11   ;;  %s2372_s10 = sphi %s2458_s10, %s3348_s10   ;;  %s2368_s9 = sphi %s2456_s9, %s3357_s9   ;;  %s2364_s8 = sphi %s2454_s8, %s3347_s8   ;;  %s2360_s30 = sphi %s2452_s30, %s3346_s30   ;;  %s2356_s29 = sphi %s2450_s29, %s3356_s29   ;;  %s2352_s28 = sphi %s2448_s28, %s3355_s28   ;;  %s2348_s27 = sphi %s2446_s27, %s3354_s27   ;;  %s2344_s26 = sphi %s2444_s26, %s3353_s26   ;;  %s2340_s25 = sphi %s2442_s25, %s3352_s25   ;;  %s2336_s24 = sphi %s2440_s24, %s3351_s24  }
  0x16   : > { %3323 = sst [smem:[#allocation15_spill]] %s2372_s10  ;;  %s1761_s15 = sadd.s32 4294967294, %s2384_s13  }
  0x17   : > { %3324 = sst [smem:[#allocation16_spill]] %s2376_s11  ;;  %s39_s16 = sadd.s32 1, %s2372_s10 }
  0x18   : > { %s42_s17 = sadd.s32 1, %s2376_s11  ;;  %p40_p0 = scmp.ge.s32.totalorder %s39_s16, 2 }
  0x19   : > { %s46_s18 = sadd.s32 1, %s2380_s12  ;;  %s53_s19 = sadd.s32 1, %s2356_s29 }
  0x1a   : > { %p60_p1 = scmp.ne.s32.totalorder %s2356_s29, %s2352_s28  ;;  %s3360_s16 = smov (%p40_p0, %s39_s16), 0 }
  0x1b   : > { %3325 = sst [smem:[#allocation17_spill]] %s3360_s16  ;;  %s3362_s17 = smov (!%p40_p0, %s42_s17), %s2376_s11 }
  0x1c   : > { %p61_p2 = scmp.eq.s32.totalorder %s2384_s13, 0  ;;  %p66_p3 = scmp.ne.s32.totalorder %s2352_s28, %s2348_s27 }
  0x1d   : > { %p44_p4 = scmp.ge.s32.totalorder %s3362_s17, 2  ;;  %p67_p5 = scmp.eq.s32.totalorder %s1760_s14, 0 }
  0x1e   : > { %p2516_p6 = por %p61_p2, %p60_p1  ;;  %s181_s21 = smul.u32 %s2372_s10, %s2376_s11 }
  0x1f   : > { %s3364_s17 = smov (%p44_p4, %s3362_s17), 0  ;;  %s3366_s18 = smov (!%p44_p4, %s46_s18), %s2380_s12 }
  0x20   : > { %3327 = sst [smem:[#allocation18_spill]] %s3364_s17  ;;  %p2525_p7 = por %p67_p5, %p66_p3 }
  0x21   : > { %s182_s23 = smul.u32 %s3364_s17, %s3360_s16  ;;  %p48_p8 = scmp.ge.s32.totalorder %s3366_s18, 2 }
  0x22   : > { %s188_s27 = sadd.s32 1, %s2344_s26  ;;  %p198_p9 = scmp.ne.s32.totalorder %s2344_s26, %s2340_s25 }
  0x23   : > { %s184_s7 = ssub.s32 %s181_s21, %s182_s23  ;;  %s3368_s18 = smov (%p48_p8, %s3366_s18), 0 }
  0x24   : > { %3329 = sst [smem:[#allocation19_spill]] %s3368_s18  ;;  %p199_p10 = scmp.eq.s32.totalorder %s1760_s14, 7 }
  0x25   : > { %p204_p11 = scmp.ne.s32.totalorder %s2340_s25, %s2336_s24  ;;  %s50_s11 = ssub.s32 %s2380_s12, %s3368_s18 }
  0x26   : > { %p205_p12 = scmp.eq.s32.totalorder %s1761_s15, 7  ;;  %p51_p13 = scmp.eq.s32.totalorder %s50_s11, 0 }
  0x27   : > { %s185_s10 = sor.u32 %s184_s7, %s50_s11  ;;  %p2540_p1 = por %p199_p10, %p198_p9 }
  0x28   : > { %p186_p0 = scmp.eq.s32.totalorder %s185_s10, 0  ;;  %p2550_p2 = por %p205_p12, %p204_p11 }
  0x29   : > { %s3330_s17 = scalar_select %p2540_p1, 1, 0 }
  0x2a   : > { %s2545_s16 = scalar_select %p51_p13, %s2356_s29, %s53_s19  }
  0x2b   : > { %s2548_s21 = scalar_select %p186_p0, %s2344_s26, %s188_s27  }
  0x2c   : > { %s3331_s23 = scalar_select %p2550_p2, 1, 0 }
  0x2d   : > { %p1966_p3 = scmp.lt.s32.totalorder %s2384_s13, 8  ;;  %s270_s14 = sand.u32 1, %s2356_s29  }
  0x2e   : > { %s1764_s15 = sshll.u32 %s270_s14, 5  ;;  %s1827_s18 = sshll.u32 %s2380_s12, 9 }
  0x2f   : > { %s3332_s0 = sld [smem:[#allocation20_spill]]  ;;  %s274_s10 = scalar_lea.vmem [#allocation5], %s1764_s15 }
  0x30   : > { %s281_s11 = sshll.u32 %s274_s10, 4  ;;  %p2566_p4 = pnand %p1966_p3, %p2516_p6  ;;  %s2562_s11 = int_to_ptr.vmem [resolvable:$true] %s281_s11 }
  0x31   : > { %s2571_s27 = scalar_lea.sflag [#allocation6], %s270_s14 }
  0x32   : > { %p2186_p9 = pneg %p2566_p4 }
  0x35   : > { %s2560_s7 = scalar_lea.hbm %s3332_s0, %s1827_s18  ;;  %s2189_s20 = scalar_lea.hbm %s3332_s0, 1024 }
  0x36   : > { %s2184_s6 = scalar_lea.hbm %s2560_s7, 512  ;;  %p2190_p6 = scmp.lt.u32.totalorder %s2560_s7, %s3332_s0 }
  0x37   : > { %p2185_p8 = scmp.ne.s32.totalorder %s2560_s7, %s2184_s6  ;;  %p2191_p12 = scmp.lt.u32.totalorder %s2189_s20, %s2184_s6 }
  0x38   : > { %p2193_p0 = scmp.lt.u32.totalorder %s2184_s6, %s2560_s7 }
  0x39   : > { %p2187_p10 = pnand %p2186_p9, %p2185_p8  ;;  %p2192_p13 = por %p2191_p12, %p2190_p6 }
  0x3b   : > { %p2188_p11 = pneg %p2187_p10  ;;  %p2194_p3 = por %p2193_p0, %p2192_p13 }
  0x3d   : > { %p2195_p5 = pnand %p2194_p3, %p2188_p11 }
  0x3f   : > { %2198 = shalt.err (!%p2195_p5)
}
  0x40   : > { %s2199_s14 = scalar_lea.vmem %s2562_s11, 512  ;;  %s2386_s24 = smov [#allocation5]  }
  0x41   : > { %p2200_p8 = scmp.ne.s32.totalorder %s2562_s11, %s2199_s14  ;;  %s2204_s18 = sshll.u32 %s2386_s24, 4  ;;  %s2205_s18 = int_to_ptr.vmem [resolvable:$false] %s2204_s18 }
  0x42   : > { %s2206_s15 = scalar_lea.vmem %s2205_s18, 1024  ;;  %p2207_p1 = scmp.lt.s32.totalorder %s2562_s11, %s2205_s18 }
  0x43   : > { %p2202_p10 = pnand %p2200_p8, %p2186_p9  ;;  %p2208_p6 = scmp.lt.s32.totalorder %s2206_s15, %s2199_s14 }
  0x45   : > { %p2203_p2 = pneg %p2202_p10  ;;  %p2209_p12 = por %p2208_p6, %p2207_p1 }
  0x47   : > { %p2210_p13 = pnand %p2209_p12, %p2203_p2 }
  0x49   : > { %2213 = shalt.err (!%p2210_p13)
}
  0x4a   : > { %s2387_s6 = smov 256   ;;  %s2388_s20 = smov 16  }
  0x4b   : > { %1958 = dma.hbm_to_vmem [thread:$0]  (!%p2566_p4), %s2560_s7, 512, %s2562_s11, %s2571_s27, %s2387_s6, %s2387_s6, %s2388_s20  }
  0x4c   : > { %p289_p5 = scmp.lt.s32.totalorder %s2384_s13, 9  ;;  %p3334_p9 = scmp.ge.s32.totalorder %s2384_s13, 1 }
  0x4e   : > { %p290_p11 = pnand %p3334_p9, %p289_p5 }
  0x4f   : > { %s295_s10 = sand.u32 (!%p290_p11), 1, %s2352_s28  }
  0x50   : > { %293 = sbr.rel (%p290_p11) target bundleno = 1580 (0x62c), region = 44  ;;  %s1768_s14 = sshll.u32 (!%p290_p11), %s295_s10, 5 }
  0x51   : > { %s296_s24 = scalar_lea.sflag (!%p290_p11), [#allocation6], %s295_s10  ;;  %s2603_s18 = scalar_lea.vmem (!%p290_p11), [#allocation5], %s1768_s14 }
  0x57   : > { %2323 = dma.done.wait (%p2525_p7), %s296_s24, 512  }
  0x58   : > { %2325 = vsyncadd (%p2525_p7), %s296_s24, 4294966784  ;;  %s2610_s7 = sshll.u32 %s2360_s30, 7  ;;  %s2613_s11 = sand.u32 1, %s2340_s25  }
  0x59   : > { %s339_s19 = sshra.s32 %s2610_s7, 7  ;;  %s1769_s27 = sshll.u32 %s2613_s11, 4 }
  0x5a   : > { %s2619_s15 = sshll.u32 %s339_s19, 3  ;;  %s1770_s6 = sshll.u32 %s2613_s11, 8 }
  0x5b   : > { %s342_s22 = scalar_lea.vmem %s2603_s18, %s2619_s15 [#allocation5]  ;;  %p345_p7 = scmp.eq.s32.totalorder %s2364_s8, 0 }
  0x5c   : > { %p346_p1 = scmp.eq.s32.totalorder %s2360_s30, 0  ;;  %v2626_v0 = vld [vmem:[%s342_s22] sm:$0xff]  ;;  %v2628_v1 = vld [vmem:[%s342_s22 + $0x10] sm:$0xff]  ;;  %s2632_s20 = scalar_lea.vmem [#allocation8], %s1769_s27 }
  0x5d   : > { %s2634_s10 = scalar_lea.vmem [#allocation9], %s1770_s6 }
  0x5e   : > { %p347_p2 = pnand %p346_p1, %p345_p7 }
  0x5f   : > { %v355_v2 = vlaneseq (!%p347_p2)  ;;  %v2389_v3 = vmov (!%p347_p2), 0.0  }
  0x60   : > { %350 = sbr.rel (%p347_p2) target bundleno = 103 (0x67), region = 52  ;;  %351 = vst [vmem:[#allocation2] sm:$0xff] (!%p347_p2), %v2389_v3  ;;  %352 = vst [vmem:[#allocation2 + $0x8] sm:$0xff] (!%p347_p2), %v2389_v3 }
  0x61   : > { %353 = vst [vmem:[#allocation2 + $0x10] sm:$0xff] (!%p347_p2), %v2389_v3  ;;  %354 = vst [vmem:[#allocation2 + $0x18] sm:$0xff] (!%p347_p2), %v2389_v3  ;;  %vm357_vm0 = vcmp.lt.s32.totalorder (!%p347_p2), %v355_v2, 256 }
  0x62   : > { %359 = vst.msk [vmem:[#allocation3] sm:$0x3] (!%p347_p2), %vm357_vm0, %v2389_v3 }
  0x67 PF: > { %p1773_p4 = scmp.ne.s32.totalorder %s2364_s8, 0 }
  0x68   : > { %365 = vxpose.xlu0.b32.start [1/2] (short) (!%p1773_p4), %v2626_v0, 128  ;;  %s3335_s1 = sld [smem:[#allocation21_spill]] (!%p1773_p4)  ;;  %v592_v7 = vld [vmem:[%s2603_s18 + $0x8] sm:$0xff] (!%p1773_p4)  ;;  %v594_v8 = vld [vmem:[%s2603_s18 + $0x18] sm:$0xff] (!%p1773_p4)  ;;  %vm397_vm1 = vcmask (!%p1773_p4), 130048   ;;  %v591_v24 = vld [vmem:[%s2603_s18] sm:$0xff] (!%p1773_p4)  ;;  %v2390_v29 = vmov (!%p1773_p4), 0.0   ;;  %v1907_v46 = vpack.c.bf16 (!%p1773_p4), %v2628_v1, %v2626_v0 }
  0x69   : > { %362 = sbr.rel (%p1773_p4) target bundleno = 1266 (0x4f2), region = 56  ;;  %v1903_v9 = vpack.c.bf16 (!%p1773_p4), %v594_v8, %v592_v7  ;;  %v593_v25 = vld [vmem:[%s2603_s18 + $0x10] sm:$0xff] (!%p1773_p4)  ;;  %s3336_s2 = sld [smem:[#allocation22_spill]] (!%p1773_p4) }
  0x6a   : > { %v1905_v27 = vpack.c.bf16 (!%p1773_p4), %v593_v25, %v591_v24  ;;  %s3337_s3 = sld [smem:[#allocation23_spill]] (!%p1773_p4)  ;;  %s1111_s14 = sshra.s32 (!%p1773_p4), %s2610_s7, 3 }
  0x6b   : > { %s1828_s24 = sshll.u32 (!%p1773_p4), %s1111_s14, 4 }
  0x6c   : > { %366 = vxpose.xlu0.b32.end [2/2] (short) (!%p1773_p4), %v2628_v1, 128  ;;  %s2949_s27 = scalar_lea.vmem (!%p1773_p4), [#allocation4], %s1828_s24 }
  0x6e   : > { %v363_v4 = vld [vmem:[%s3335_s1] sm:$0xff] (!%p1773_p4)  ;;  %v364_v5 = vld [vmem:[%s3335_s1 + $0x8] sm:$0xff] (!%p1773_p4) }
  0x6f   : > { %v1899_v6 = vpack.c.bf16 (!%p1773_p4), %v364_v5, %v363_v4 }
  0x71   : > { %1900 = vmatprep.subr.bf16.mxu0 %v1899_v6  ;;  %1947 = vmatprep.subr.bf16.mxu1 %v1899_v6 }
  0x72   : > { %1902 = vmatpush3.bf16.msra.mxu0 %v1899_v6  ;;  %1948 = vmatpush3.bf16.msra.mxu1 %v1899_v6 }
  0x73   : > { %1904 = vmatprep.subr.bf16.mxu1 %v1903_v9  ;;  %1908 = vmatprep.subr.bf16.mxu0 %v1907_v46 }
  0xe8   : > { %v381_v10 = vpop.trf.xlu0 }
  0xe9   : > { %1861 = vmatprep.mubr.msk.f32.mxu0 %vm397_vm1, %v381_v10 }
  0xec   : > { %v382_v11 = vpop.trf.xlu0 }
  0xed   : > { %1862 = vmatmul.mubr.msk.f32.vlgmr.msra.gmra.mrb[0].mxu0 %vm397_vm1, %v382_v11 }
  0xee   : > { %1910 = vmatpush3.bf16.msra.mxu0 %v1907_v46 }
  0xf0   : > { %v383_v12 = vpop.trf.xlu0 }
  0xf1   : > { %1864 = vmatprep.mubr.msk.f32.mxu0 %vm397_vm1, %v383_v12 }
  0xf4   : > { %v384_v13 = vpop.trf.xlu0 }
  0xf5   : > { %1865 = vmatmul.mubr.msk.f32.gmra.mrb[2].mxu0 %vm397_vm1, %v384_v13 }
  0xf8   : > { %v385_v14 = vpop.trf.xlu0 }
  0xf9   : > { %1867 = vmatprep.mubr.msk.f32.mxu0 %vm397_vm1, %v385_v14 }
  0xfc   : > { %v386_v15 = vpop.trf.xlu0 }
  0xfd   : > { %1868 = vmatmul.mubr.msk.f32.gmra.mrb[4].mxu0 %vm397_vm1, %v386_v15  ;;  %v1148_v15 = vld [vmem:[%s3336_s2] sm:$0xff] }
 0x100   : > { %v387_v16 = vpop.trf.xlu0 }
 0x101   : > { %1870 = vmatprep.mubr.msk.f32.mxu0 %vm397_vm1, %v387_v16 }
 0x104   : > { %v388_v17 = vpop.trf.xlu0 }
 0x105   : > { %1871 = vmatmul.mubr.msk.f32.gmra.mrb[6].mxu0 %vm397_vm1, %v388_v17  ;;  %v1149_v17 = vld [vmem:[%s3336_s2 + $0x8] sm:$0xff] }
 0x108   : > { %v389_v18 = vpop.trf.xlu0 }
 0x109   : > { %1873 = vmatprep.mubr.msk.f32.mxu0 %vm397_vm1, %v389_v18 }
 0x10c   : > { %v390_v19 = vpop.trf.xlu0 }
 0x10d   : > { %1874 = vmatmul.mubr.msk.f32.gmra.mrb[8].mxu0 %vm397_vm1, %v390_v19 }
 0x110   : > { %v391_v20 = vpop.trf.xlu0 }
 0x111   : > { %1876 = vmatprep.mubr.msk.f32.mxu0 %vm397_vm1, %v391_v20 }
 0x114   : > { %v392_v21 = vpop.trf.xlu0 }
 0x115   : > { %1877 = vmatmul.mubr.msk.f32.gmra.mrb[10].mxu0 %vm397_vm1, %v392_v21 }
 0x118   : > { %v393_v22 = vpop.trf.xlu0 }
 0x119   : > { %1879 = vmatprep.mubr.msk.f32.mxu0 %vm397_vm1, %v393_v22 }
 0x11c   : > { %v394_v23 = vpop.trf.xlu0 }
 0x11d   : > { %1880 = vmatmul.mubr.msk.f32.gmra.mrb[12].mxu0 %vm397_vm1, %v394_v23 }
 0x11e   : > { %1889 = vmatprep.mubr.msk.f32.mxu0 %vm397_vm1, %v1148_v15 }
 0x120   : > { %v395_v26 = vpop.trf.xlu0 }
 0x121   : > { %1882 = vmatprep.mubr.msk.f32.mxu1 %vm397_vm1, %v395_v26  ;;  %1890 = vmatmul.mubr.msk.f32.vlgmr.msra.gmra.mrb[14].mxu0 %vm397_vm1, %v1149_v17 }
 0x122   : > { %1311 = vmatprep.mubr.f32.mxu0 %v2390_v29 }
 0x124   : > { %v396_v28 = vpop.trf.xlu0 }
 0x125   : > { %1883 = vmatmul.mubr.msk.f32.vlgmr.msra.gmra.mrb[0].mxu1 %vm397_vm1, %v396_v28 }
 0x126   : > { %1906 = vmatpush1.bf16.msra.mxu1 %v1905_v27  ;;  %707 = vmatprep.mubr.f32.mxu1 %v2390_v29 }
 0x1c0   : > { %v1863_v30 = vpop.f32.mrb[0].mxu0 }
 0x1c1   : > { %v512_v31 = vpop.f32.mrb[1].mxu0 }
 0x1c2   : > { %1790 = vmatmul.mubr.msk.f32.vlgmr.msra.gmra.mrb[2].mxu1 %vm397_vm1, %v512_v31 }
 0x1c3   : > { %713 = vmatprep.mubr.f32.mxu1 %v2390_v29 }
 0x1c6   : > { %1791 = vmatmul.mubr.msk.f32.gmra.mrb[4].mxu1 %vm397_vm1, %v1863_v30 }
 0x1c7   : > { %719 = vmatprep.mubr.f32.mxu1 %v2390_v29 }
 0x1c8   : > { %v1866_v32 = vpop.f32.mrb[2].mxu0 }
 0x1c9   : > { %v522_v33 = vpop.f32.mrb[3].mxu0 }
 0x1ca   : > { %1792 = vmatmul.mubr.msk.f32.gmra.mrb[6].mxu1 %vm397_vm1, %v522_v33 }
 0x1cb   : > { %725 = vmatprep.mubr.f32.mxu1 %v2390_v29 }
 0x1ce   : > { %1793 = vmatmul.mubr.msk.f32.gmra.mrb[8].mxu1 %vm397_vm1, %v1866_v32 }
 0x1cf   : > { %731 = vmatprep.mubr.f32.mxu1 %v2390_v29 }
 0x1d0   : > { %v1869_v34 = vpop.f32.mrb[4].mxu0 }
 0x1d1   : > { %v532_v35 = vpop.f32.mrb[5].mxu0 }
 0x1d2   : > { %1794 = vmatmul.mubr.msk.f32.gmra.mrb[10].mxu1 %vm397_vm1, %v532_v35 }
 0x1d3   : > { %737 = vmatprep.mubr.f32.mxu1 %v2390_v29 }
 0x1d6   : > { %1795 = vmatmul.mubr.msk.f32.gmra.mrb[12].mxu1 %vm397_vm1, %v1869_v34 }
 0x1d7   : > { %743 = vmatprep.mubr.f32.mxu1 %v2390_v29 }
 0x1d8   : > { %v1872_v36 = vpop.f32.mrb[6].mxu0 }
 0x1d9   : > { %v542_v37 = vpop.f32.mrb[7].mxu0 }
 0x1da   : > { %1796 = vmatmul.mubr.msk.f32.gmra.mrb[14].mxu1 %vm397_vm1, %v542_v37 }
 0x1db   : > { %749 = vmatprep.mubr.f32.mxu1 %v2390_v29 }
 0x1de   : > { %1797 = vmatmul.mubr.msk.f32.gmra.mrb[16].mxu1 %vm397_vm1, %v1872_v36  ;;  %v2391_v36 = vmov 0  }
 0x1df   : > { %755 = vmatprep.mubr.f32.mxu1 %v2390_v29  ;;  %2084 = vset.pattern.permute.xlu0 %v2391_v36 }
 0x1e0   : > { %v1875_v38 = vpop.f32.mrb[8].mxu0  ;;  %2083 = vset.pattern.permute.xlu1 %v2391_v36 }
 0x1e1   : > { %v552_v39 = vpop.f32.mrb[9].mxu0 }
 0x1e2   : > { %1798 = vmatmul.mubr.msk.f32.gmra.mrb[18].mxu1 %vm397_vm1, %v552_v39 }
 0x1e3   : > { %761 = vmatprep.mubr.f32.mxu1 %v2390_v29 }
 0x1e6   : > { %1799 = vmatmul.mubr.msk.f32.gmra.mrb[20].mxu1 %vm397_vm1, %v1875_v38 }
 0x1e7   : > { %767 = vmatprep.mubr.f32.mxu1 %v2390_v29 }
 0x1e8   : > { %v1878_v40 = vpop.f32.mrb[10].mxu0 }
 0x1e9   : > { %v562_v41 = vpop.f32.mrb[11].mxu0 }
 0x1ea   : > { %1800 = vmatmul.mubr.msk.f32.gmra.mrb[22].mxu1 %vm397_vm1, %v562_v41 }
 0x1eb   : > { %773 = vmatprep.mubr.f32.mxu1 %v2390_v29 }
 0x1ee   : > { %1801 = vmatmul.mubr.msk.f32.gmra.mrb[24].mxu1 %vm397_vm1, %v1878_v40 }
 0x1ef   : > { %779 = vmatprep.mubr.f32.mxu1 %v2390_v29 }
 0x1f0   : > { %v1881_v42 = vpop.f32.mrb[12].mxu0 }
 0x1f1   : > { %v572_v43 = vpop.f32.mrb[13].mxu0 }
 0x1f2   : > { %1802 = vmatmul.mubr.msk.f32.gmra.mrb[26].mxu1 %vm397_vm1, %v572_v43 }
 0x1f3   : > { %785 = vmatprep.mubr.f32.mxu1 %v2390_v29 }
 0x1f6   : > { %1803 = vmatmul.mubr.msk.f32.gmra.mrb[28].mxu1 %vm397_vm1, %v1881_v42 }
 0x1f7   : > { %791 = vmatprep.mubr.f32.mxu1 %v2390_v29 }
 0x1f8   : > { %v1884_v44 = vpop.f32.mrb[0].mxu1 }
 0x1f9   : > { %v582_v45 = vpop.f32.mrb[1].mxu1 }
 0x1fa   : > { %1804 = vmatmul.mubr.msk.f32.gmra.mrb[30].mxu1 %vm397_vm1, %v582_v45 }
 0x1fb   : > { %797 = vmatprep.mubr.f32.mxu1 %v2390_v29 }
 0x1fe   : > { %1805 = vmatmul.mubr.msk.f32.gmra.mrb[32].mxu1 %vm397_vm1, %v1884_v44 }
 0x295   : > { %v2699_v47 = vpop.f32.mrb[2].mxu1 }
 0x296   : > { %v2701_v48 = vpop.f32.mrb[3].mxu1 }
 0x297   : > { %v804_v49 = vmax.f32 %v2699_v47, %v2701_v48 }
 0x299   : > { %805 = vmax.xlane.f32.xlu1 %v804_v49  ;;  %v2705_v50 = vpop.f32.mrb[4].mxu1 }
 0x29a   : > { %v2707_v51 = vpop.f32.mrb[5].mxu1 }
 0x29b   : > { %v807_v52 = vmax.f32 %v2705_v50, %v2707_v51 }
 0x29d   : > { %808 = vmax.xlane.f32.xlu1 %v807_v52  ;;  %v2711_v53 = vpop.f32.mrb[6].mxu1 }
 0x29e   : > { %v2713_v54 = vpop.f32.mrb[7].mxu1 }
 0x29f   : > { %v810_v55 = vmax.f32 %v2711_v53, %v2713_v54 }
 0x2a1   : > { %811 = vmax.xlane.f32.xlu0 %v810_v55  ;;  %v2717_v56 = vpop.f32.mrb[8].mxu1 }
 0x2a2   : > { %v2719_v57 = vpop.f32.mrb[9].mxu1 }
 0x2a3   : > { %v813_v58 = vmax.f32 %v2717_v56, %v2719_v57 }
 0x2a5   : > { %814 = vmax.xlane.f32.xlu1 %v813_v58  ;;  %v2723_v59 = vpop.f32.mrb[10].mxu1 }
 0x2a6   : > { %v2725_v60 = vpop.f32.mrb[11].mxu1 }
 0x2a7   : > { %v816_v61 = vmax.f32 %v2723_v59, %v2725_v60 }
 0x2a9   : > { %817 = vmax.xlane.f32.xlu1 %v816_v61  ;;  %v2729_v62 = vpop.f32.mrb[12].mxu1 }
 0x2aa   : > { %v2731_v63 = vpop.f32.mrb[13].mxu1 }
 0x2ab   : > { %v819_v2 = vmax.f32 %v2729_v62, %v2731_v63 }
 0x2ad   : > { %820 = vmax.xlane.f32.xlu1 %v819_v2  ;;  %v2735_v3 = vpop.f32.mrb[14].mxu1 }
 0x2ae   : > { %v2737_v4 = vpop.f32.mrb[15].mxu1 }
 0x2af   : > { %v822_v5 = vmax.f32 %v2735_v3, %v2737_v4 }
 0x2b1   : > { %823 = vmax.xlane.f32.xlu1 %v822_v5  ;;  %v2741_v6 = vpop.f32.mrb[16].mxu1 }
 0x2b2   : > { %v2743_v7 = vpop.f32.mrb[17].mxu1 }
 0x2b3   : > { %v825_v8 = vmax.f32 %v2741_v6, %v2743_v7 }
 0x2b5   : > { %826 = vmax.xlane.f32.xlu1 %v825_v8  ;;  %v2747_v9 = vpop.f32.mrb[18].mxu1 }
 0x2b6   : > { %v2749_v10 = vpop.f32.mrb[19].mxu1 }
 0x2b7   : > { %v828_v11 = vmax.f32 %v2747_v9, %v2749_v10 }
 0x2b9   : > { %829 = vmax.xlane.f32.xlu1 %v828_v11  ;;  %v2753_v12 = vpop.f32.mrb[20].mxu1 }
 0x2ba   : > { %v2755_v13 = vpop.f32.mrb[21].mxu1 }
 0x2bb   : > { %v831_v14 = vmax.f32 %v2753_v12, %v2755_v13 }
 0x2bd   : > { %832 = vmax.xlane.f32.xlu1 %v831_v14  ;;  %v2762_v16 = vpop.f32.mrb[22].mxu1 }
 0x2be   : > { %v2768_v18 = vpop.f32.mrb[23].mxu1 }
 0x2bf   : > { %v834_v19 = vmax.f32 %v2762_v16, %v2768_v18 }
 0x2c1   : > { %835 = vmax.xlane.f32.xlu1 %v834_v19  ;;  %v2774_v20 = vpop.f32.mrb[24].mxu1 }
 0x2c2   : > { %v2776_v21 = vpop.f32.mrb[25].mxu1 }
 0x2c3   : > { %v837_v22 = vmax.f32 %v2774_v20, %v2776_v21 }
 0x2c5   : > { %838 = vmax.xlane.f32.xlu1 %v837_v22  ;;  %v2780_v23 = vpop.f32.mrb[26].mxu1 }
 0x2c6   : > { %v2782_v24 = vpop.f32.mrb[27].mxu1 }
 0x2c7   : > { %v840_v25 = vmax.f32 %v2780_v23, %v2782_v24 }
 0x2c9   : > { %841 = vmax.xlane.f32.xlu1 %v840_v25  ;;  %v2786_v26 = vpop.f32.mrb[28].mxu1 }
 0x2ca   : > { %v2788_v27 = vpop.f32.mrb[29].mxu1 }
 0x2cb   : > { %v843_v28 = vmax.f32 %v2786_v26, %v2788_v27 }
 0x2cd   : > { %844 = vmax.xlane.f32.xlu1 %v843_v28  ;;  %v2792_v30 = vpop.f32.mrb[30].mxu1 }
 0x2ce   : > { %v2794_v31 = vpop.f32.mrb[31].mxu1 }
 0x2cf   : > { %v846_v32 = vmax.f32 %v2792_v30, %v2794_v31 }
 0x2d1   : > { %847 = vmax.xlane.f32.xlu1 %v846_v32  ;;  %v2798_v33 = vpop.f32.mrb[32].mxu1 }
 0x2d2   : > { %v2800_v34 = vpop.f32.mrb[33].mxu1 }
 0x2d3   : > { %v849_v35 = vmax.f32 %v2798_v33, %v2800_v34 }
 0x2d5   : > { %850 = vmax.xlane.f32.xlu1 %v849_v35 }
 0x326   : > { %v806_v37 = vpop.xlane.xlu1 %805 }
 0x327   : > { %v852_v38 = vsub.f32 %v2699_v47, %v806_v37  ;;  %v853_v39 = vsub.f32 %v2701_v48, %v806_v37 }
 0x329   : > { %v884_v40 = vmul.f32 1.442695, %v852_v38  ;;  %v886_v41 = vmul.f32 1.442695, %v853_v39 }
 0x32a   : > { %v809_v42 = vpop.xlane.xlu1 %808 }
 0x32b   : > { %2085 = vpow2.f32 %v884_v40  ;;  %v854_v43 = vsub.f32 %v2705_v50, %v809_v42  ;;  %v855_v44 = vsub.f32 %v2707_v51, %v809_v42 }
 0x32c   : > { %2087 = vpow2.f32 %v886_v41 }
 0x32d   : > { %v888_v45 = vmul.f32 1.442695, %v854_v43  ;;  %v890_v46 = vmul.f32 1.442695, %v855_v44 }
 0x32e   : > { %v812_v49 = vpop.xlane.xlu0 %811 }
 0x32f   : > { %2089 = vpow2.f32 %v888_v45  ;;  %v856_v52 = vsub.f32 %v2711_v53, %v812_v49  ;;  %v857_v55 = vsub.f32 %v2713_v54, %v812_v49 }
 0x330   : > { %2091 = vpow2.f32 %v890_v46 }
 0x331   : > { %v892_v47 = vmul.f32 1.442695, %v856_v52  ;;  %v894_v48 = vmul.f32 1.442695, %v857_v55 }
 0x332   : > { %v815_v58 = vpop.xlane.xlu1 %814 }
 0x333   : > { %2093 = vpow2.f32 %v892_v47  ;;  %v858_v61 = vsub.f32 %v2717_v56, %v815_v58  ;;  %v859_v50 = vsub.f32 %v2719_v57, %v815_v58 }
 0x334   : > { %2095 = vpow2.f32 %v894_v48 }
 0x335   : > { %v2812_v51 = vpop.eup %2085  ;;  %v896_v2 = vmul.f32 1.442695, %v858_v61  ;;  %v898_v5 = vmul.f32 1.442695, %v859_v50 }
 0x336   : > { %v2814_v8 = vpop.eup %2087  ;;  %v818_v11 = vpop.xlane.xlu1 %817 }
 0x337   : > { %2097 = vpow2.f32 %v896_v2  ;;  %v860_v53 = vsub.f32 %v2723_v59, %v818_v11  ;;  %v861_v54 = vsub.f32 %v2725_v60, %v818_v11  ;;  %v948_v14 = vadd.f32 %v2814_v8, %v2812_v51 }
 0x338   : > { %2099 = vpow2.f32 %v898_v5 }
 0x339   : > { %v2820_v56 = vpop.eup %2089  ;;  %v900_v57 = vmul.f32 1.442695, %v860_v53  ;;  %v902_v15 = vmul.f32 1.442695, %v861_v54  ;;  %949 = vadd.xlane.f32.xlu1 %v948_v14 }
 0x33a   : > { %v2822_v17 = vpop.eup %2091  ;;  %v821_v19 = vpop.xlane.xlu1 %820 }
 0x33b   : > { %2101 = vpow2.f32 %v900_v57  ;;  %v862_v22 = vsub.f32 %v2729_v62, %v821_v19  ;;  %v863_v25 = vsub.f32 %v2731_v63, %v821_v19  ;;  %v951_v59 = vadd.f32 %v2822_v17, %v2820_v56 }
 0x33c   : > { %2103 = vpow2.f32 %v902_v15 }
 0x33d   : > { %v2828_v60 = vpop.eup %2093  ;;  %v904_v28 = vmul.f32 1.442695, %v862_v22  ;;  %v906_v32 = vmul.f32 1.442695, %v863_v25  ;;  %952 = vadd.xlane.f32.xlu1 %v951_v59 }
 0x33e   : > { %v2830_v35 = vpop.eup %2095  ;;  %v824_v36 = vpop.xlane.xlu1 %823 }
 0x33f   : > { %2105 = vpow2.f32 %v904_v28  ;;  %v864_v37 = vsub.f32 %v2735_v3, %v824_v36  ;;  %v865_v38 = vsub.f32 %v2737_v4, %v824_v36  ;;  %v954_v62 = vadd.f32 %v2830_v35, %v2828_v60 }
 0x340   : > { %2107 = vpow2.f32 %v906_v32 }
 0x341   : > { %v2836_v63 = vpop.eup %2097  ;;  %v908_v39 = vmul.f32 1.442695, %v864_v37  ;;  %v910_v40 = vmul.f32 1.442695, %v865_v38  ;;  %955 = vadd.xlane.f32.xlu1 %v954_v62 }
 0x342   : > { %v2838_v41 = vpop.eup %2099  ;;  %v827_v42 = vpop.xlane.xlu1 %826 }
 0x343   : > { %2109 = vpow2.f32 %v908_v39  ;;  %v866_v43 = vsub.f32 %v2741_v6, %v827_v42  ;;  %v867_v44 = vsub.f32 %v2743_v7, %v827_v42  ;;  %v957_v3 = vadd.f32 %v2838_v41, %v2836_v63 }
 0x344   : > { %2111 = vpow2.f32 %v910_v40 }
 0x345   : > { %v2844_v4 = vpop.eup %2101  ;;  %v912_v45 = vmul.f32 1.442695, %v866_v43  ;;  %v914_v46 = vmul.f32 1.442695, %v867_v44  ;;  %958 = vadd.xlane.f32.xlu1 %v957_v3 }
 0x346   : > { %v2846_v49 = vpop.eup %2103  ;;  %v830_v52 = vpop.xlane.xlu1 %829 }
 0x347   : > { %2113 = vpow2.f32 %v912_v45  ;;  %v868_v55 = vsub.f32 %v2747_v9, %v830_v52  ;;  %v869_v47 = vsub.f32 %v2749_v10, %v830_v52  ;;  %v960_v6 = vadd.f32 %v2846_v49, %v2844_v4 }
 0x348   : > { %2115 = vpow2.f32 %v914_v46 }
 0x349   : > { %v2852_v7 = vpop.eup %2105  ;;  %v916_v48 = vmul.f32 1.442695, %v868_v55  ;;  %v918_v58 = vmul.f32 1.442695, %v869_v47  ;;  %961 = vadd.xlane.f32.xlu1 %v960_v6 }
 0x34a   : > { %v2854_v61 = vpop.eup %2107  ;;  %v833_v50 = vpop.xlane.xlu1 %832 }
 0x34b   : > { %2117 = vpow2.f32 %v916_v48  ;;  %v870_v2 = vsub.f32 %v2753_v12, %v833_v50  ;;  %v871_v5 = vsub.f32 %v2755_v13, %v833_v50  ;;  %v963_v9 = vadd.f32 %v2854_v61, %v2852_v7 }
 0x34c   : > { %2119 = vpow2.f32 %v918_v58 }
 0x34d   : > { %v2860_v10 = vpop.eup %2109  ;;  %v920_v11 = vmul.f32 1.442695, %v870_v2  ;;  %v922_v53 = vmul.f32 1.442695, %v871_v5  ;;  %964 = vadd.xlane.f32.xlu1 %v963_v9 }
 0x34e   : > { %v2862_v54 = vpop.eup %2111  ;;  %v836_v14 = vpop.xlane.xlu1 %835 }
 0x34f   : > { %2121 = vpow2.f32 %v920_v11  ;;  %v872_v57 = vsub.f32 %v2762_v16, %v836_v14  ;;  %v873_v15 = vsub.f32 %v2768_v18, %v836_v14  ;;  %v966_v12 = vadd.f32 %v2862_v54, %v2860_v10 }
 0x350   : > { %2123 = vpow2.f32 %v922_v53 }
 0x351   : > { %v2868_v13 = vpop.eup %2113  ;;  %v924_v19 = vmul.f32 1.442695, %v872_v57  ;;  %v926_v22 = vmul.f32 1.442695, %v873_v15  ;;  %967 = vadd.xlane.f32.xlu1 %v966_v12 }
 0x352   : > { %v2870_v25 = vpop.eup %2115  ;;  %v839_v59 = vpop.xlane.xlu1 %838 }
 0x353   : > { %2125 = vpow2.f32 %v924_v19  ;;  %v874_v28 = vsub.f32 %v2774_v20, %v839_v59  ;;  %v875_v32 = vsub.f32 %v2776_v21, %v839_v59  ;;  %v969_v16 = vadd.f32 %v2870_v25, %v2868_v13 }
 0x354   : > { %2127 = vpow2.f32 %v926_v22 }
 0x355   : > { %v2876_v18 = vpop.eup %2117  ;;  %v928_v36 = vmul.f32 1.442695, %v874_v28  ;;  %v930_v37 = vmul.f32 1.442695, %v875_v32  ;;  %970 = vadd.xlane.f32.xlu1 %v969_v16 }
 0x356   : > { %v2878_v38 = vpop.eup %2119  ;;  %v842_v62 = vpop.xlane.xlu1 %841 }
 0x357   : > { %2129 = vpow2.f32 %v928_v36  ;;  %v876_v39 = vsub.f32 %v2780_v23, %v842_v62  ;;  %v877_v40 = vsub.f32 %v2782_v24, %v842_v62  ;;  %v972_v20 = vadd.f32 %v2878_v38, %v2876_v18  ;;  %v1151_v62 = vld [vmem:[%s3337_s3 + $0x8] sm:$0xff] }
 0x358   : > { %2131 = vpow2.f32 %v930_v37  ;;  %v1150_v37 = vld [vmem:[%s3337_s3] sm:$0xff] }
 0x359   : > { %v2884_v21 = vpop.eup %2121  ;;  %v932_v42 = vmul.f32 1.442695, %v876_v39  ;;  %v934_v43 = vmul.f32 1.442695, %v877_v40  ;;  %973 = vadd.xlane.f32.xlu1 %v972_v20  ;;  %v2938_v39 = vpop.f32.mrb[14].mxu0 }
 0x35a   : > { %v2886_v44 = vpop.eup %2123  ;;  %v845_v3 = vpop.xlane.xlu1 %844 }
 0x35b   : > { %2133 = vpow2.f32 %v932_v42  ;;  %v878_v45 = vsub.f32 %v2786_v26, %v845_v3  ;;  %v879_v46 = vsub.f32 %v2788_v27, %v845_v3  ;;  %v975_v23 = vadd.f32 %v2886_v44, %v2884_v21  ;;  %v2940_v40 = vpop.f32.mrb[15].mxu0 }
 0x35c   : > { %2135 = vpow2.f32 %v934_v43 }
 0x35d   : > { %v2892_v24 = vpop.eup %2125  ;;  %v936_v52 = vmul.f32 1.442695, %v878_v45  ;;  %v938_v55 = vmul.f32 1.442695, %v879_v46  ;;  %976 = vadd.xlane.f32.xlu1 %v975_v23 }
 0x35e   : > { %v2894_v47 = vpop.eup %2127  ;;  %v848_v6 = vpop.xlane.xlu1 %847 }
 0x35f   : > { %2137 = vpow2.f32 %v936_v52  ;;  %v880_v48 = vsub.f32 %v2792_v30, %v848_v6  ;;  %v881_v58 = vsub.f32 %v2794_v31, %v848_v6  ;;  %v978_v26 = vadd.f32 %v2894_v47, %v2892_v24 }
 0x360   : > { %2139 = vpow2.f32 %v938_v55 }
 0x361   : > { %v2900_v27 = vpop.eup %2129  ;;  %v940_v50 = vmul.f32 1.442695, %v880_v48  ;;  %v942_v2 = vmul.f32 1.442695, %v881_v58  ;;  %979 = vadd.xlane.f32.xlu1 %v978_v26 }
 0x362   : > { %v2902_v5 = vpop.eup %2131  ;;  %v851_v9 = vpop.xlane.xlu1 %850 }
 0x363   : > { %2141 = vpow2.f32 %v940_v50  ;;  %v882_v11 = vsub.f32 %v2798_v33, %v851_v9  ;;  %v883_v53 = vsub.f32 %v2800_v34, %v851_v9  ;;  %v981_v30 = vadd.f32 %v2902_v5, %v2900_v27 }
 0x364   : > { %2143 = vpow2.f32 %v942_v2 }
 0x365   : > { %v2908_v31 = vpop.eup %2133  ;;  %v944_v14 = vmul.f32 1.442695, %v882_v11  ;;  %v946_v57 = vmul.f32 1.442695, %v883_v53  ;;  %982 = vadd.xlane.f32.xlu1 %v981_v30 }
 0x366   : > { %v2910_v15 = vpop.eup %2135 }
 0x367   : > { %2145 = vpow2.f32 %v944_v14  ;;  %v984_v12 = vadd.f32 %v2910_v15, %v2908_v31 }
 0x368   : > { %2147 = vpow2.f32 %v946_v57 }
 0x369   : > { %v2914_v19 = vpop.eup %2137  ;;  %985 = vadd.xlane.f32.xlu1 %v984_v12 }
 0x36a   : > { %v2916_v33 = vpop.eup %2139 }
 0x36b   : > { %v987_v34 = vadd.f32 %v2916_v33, %v2914_v19 }
 0x36d   : > { %v2920_v22 = vpop.eup %2141  ;;  %988 = vadd.xlane.f32.xlu0 %v987_v34 }
 0x36e   : > { %v2922_v59 = vpop.eup %2143 }
 0x36f   : > { %v990_v28 = vadd.f32 %v2922_v59, %v2920_v22 }
 0x371   : > { %v2926_v32 = vpop.eup %2145  ;;  %991 = vadd.xlane.f32.xlu1 %v990_v28 }
 0x372   : > { %v2928_v16 = vpop.eup %2147 }
 0x373   : > { %v993_v36 = vadd.f32 %v2928_v16, %v2926_v32 }
 0x375   : > { %994 = vadd.xlane.f32.xlu0 %v993_v36 }
 0x382   : > { %1154 = vperm.xlu1 %2083, %v1150_v37  }
 0x38b   : > { %1159 = vperm.xlu0 %2084, %v1151_v62  }
 0x3c6   : > { %v950_v20 = vpop.xlane.xlu1 %949 }
 0x3c7   : > { %2149 = vrcp.f32 %v950_v20 }
 0x3ca   : > { %v953_v42 = vpop.xlane.xlu1 %952 }
 0x3cb   : > { %2151 = vrcp.f32 %v953_v42 }
 0x3ce   : > { %v956_v43 = vpop.xlane.xlu1 %955 }
 0x3cf   : > { %2153 = vrcp.f32 %v956_v43 }
 0x3d1   : > { %v2150_v3 = vpop.eup %2149 }
 0x3d2   : > { %v2944_v45 = vmul.f32 %v2150_v3, %v2812_v51  ;;  %v959_v46 = vpop.xlane.xlu1 %958  ;;  %v2947_v23 = vmul.f32 %v2150_v3, %v2814_v8 }
 0x3d3   : > { %2155 = vrcp.f32 %v959_v46 }
 0x3d4   : > { %1116 = vst [vmem:[%s2949_s27] sm:$0xff] %v2944_v45  ;;  %1117 = vst [vmem:[%s2949_s27 + $0x8] sm:$0xff] %v2947_v23 }
 0x3d5   : > { %v2152_v52 = vpop.eup %2151 }
 0x3d6   : > { %v2956_v51 = vmul.f32 %v2152_v52, %v2820_v56  ;;  %v962_v55 = vpop.xlane.xlu1 %961  ;;  %v2959_v8 = vmul.f32 %v2152_v52, %v2822_v17 }
 0x3d7   : > { %2157 = vrcp.f32 %v962_v55 }
 0x3d8   : > { %1118 = vst [vmem:[%s2949_s27 + $0x10] sm:$0xff] %v2956_v51  ;;  %1119 = vst [vmem:[%s2949_s27 + $0x18] sm:$0xff] %v2959_v8  ;;  %v1911_v6 = vpack.c.bf16 %v2959_v8, %v2947_v23  ;;  %v1913_v48 = vpack.c.bf16 %v2956_v51, %v2944_v45 }
 0x3d9   : > { %v2154_v56 = vpop.eup %2153 }
 0x3da   : > { %v2970_v58 = vmul.f32 %v2154_v56, %v2828_v60  ;;  %1912 = vmatprep.subr.bf16.mxu0 %v1911_v6  ;;  %v965_v17 = vpop.xlane.xlu1 %964  ;;  %v2973_v26 = vmul.f32 %v2154_v56, %v2830_v35 }
 0x3db   : > { %2159 = vrcp.f32 %v965_v17  ;;  %1914 = vmatpush1.bf16.msra.mxu0 %v1913_v48 }
 0x3dc   : > { %1120 = vst [vmem:[%s2949_s27 + $0x20] sm:$0xff] %v2970_v58  ;;  %1121 = vst [vmem:[%s2949_s27 + $0x28] sm:$0xff] %v2973_v26 }
 0x3dd   : > { %v2156_v50 = vpop.eup %2155 }
 0x3de   : > { %v1018_v2 = vmul.f32 %v2156_v50, %v2836_v63  ;;  %v968_v9 = vpop.xlane.xlu1 %967  ;;  %v1019_v60 = vmul.f32 %v2156_v50, %v2838_v41 }
 0x3df   : > { %2161 = vrcp.f32 %v968_v9 }
 0x3e0   : > { %1122 = vst [vmem:[%s2949_s27 + $0x30] sm:$0xff] %v1018_v2  ;;  %1123 = vst [vmem:[%s2949_s27 + $0x38] sm:$0xff] %v1019_v60  ;;  %v1915_v35 = vpack.c.bf16 %v1019_v60, %v2973_v26  ;;  %v1917_v11 = vpack.c.bf16 %v1018_v2, %v2970_v58 }
 0x3e1   : > { %v2158_v53 = vpop.eup %2157 }
 0x3e2   : > { %v1020_v30 = vmul.f32 %v2158_v53, %v2844_v4  ;;  %1916 = vmatprep.subr.bf16.mxu0 %v1915_v35  ;;  %v971_v14 = vpop.xlane.xlu1 %970  ;;  %v1021_v63 = vmul.f32 %v2158_v53, %v2846_v49 }
 0x3e3   : > { %2163 = vrcp.f32 %v971_v14  ;;  %1918 = vmatpush1.bf16.msra.mxu0 %v1917_v11 }
 0x3e4   : > { %1124 = vst [vmem:[%s2949_s27 + $0x40] sm:$0xff] %v1020_v30  ;;  %1125 = vst [vmem:[%s2949_s27 + $0x48] sm:$0xff] %v1021_v63 }
 0x3e5   : > { %v2160_v41 = vpop.eup %2159 }
 0x3e6   : > { %v1022_v57 = vmul.f32 %v2160_v41, %v2852_v7  ;;  %v974_v12 = vpop.xlane.xlu1 %973  ;;  %v1023_v34 = vmul.f32 %v2160_v41, %v2854_v61 }
 0x3e7   : > { %2165 = vrcp.f32 %v974_v12 }
 0x3e8   : > { %1126 = vst [vmem:[%s2949_s27 + $0x50] sm:$0xff] %v1022_v57  ;;  %1127 = vst [vmem:[%s2949_s27 + $0x58] sm:$0xff] %v1023_v34  ;;  %v1919_v4 = vpack.c.bf16 %v1023_v34, %v1021_v63  ;;  %v1921_v28 = vpack.c.bf16 %v1022_v57, %v1020_v30 }
 0x3e9   : > { %v2162_v49 = vpop.eup %2161 }
 0x3ea   : > { %v1024_v36 = vmul.f32 %v2162_v49, %v2860_v10  ;;  %1920 = vmatprep.subr.bf16.mxu0 %v1919_v4  ;;  %v977_v37 = vpop.xlane.xlu1 %976  ;;  %v1025_v62 = vmul.f32 %v2162_v49, %v2862_v54 }
 0x3eb   : > { %2167 = vrcp.f32 %v977_v37  ;;  %1922 = vmatpush1.bf16.msra.mxu0 %v1921_v28 }
 0x3ec   : > { %1128 = vst [vmem:[%s2949_s27 + $0x60] sm:$0xff] %v1024_v36  ;;  %1129 = vst [vmem:[%s2949_s27 + $0x68] sm:$0xff] %v1025_v62 }
 0x3ed   : > { %v2164_v7 = vpop.eup %2163 }
 0x3ee   : > { %v1026_v61 = vmul.f32 %v2164_v7, %v2868_v13  ;;  %v980_v20 = vpop.xlane.xlu1 %979  ;;  %v1027_v42 = vmul.f32 %v2164_v7, %v2870_v25  ;;  %v1045_v13 = vadd.f32 %v2956_v51, %v2944_v45  ;;  %v1066_v25 = vadd.f32 %v2959_v8, %v2947_v23 }
 0x3ef   : > { %2169 = vrcp.f32 %v980_v20 }
 0x3f0   : > { %1130 = vst [vmem:[%s2949_s27 + $0x70] sm:$0xff] %v1026_v61  ;;  %1131 = vst [vmem:[%s2949_s27 + $0x78] sm:$0xff] %v1027_v42  ;;  %v1923_v10 = vpack.c.bf16 %v1027_v42, %v1025_v62  ;;  %v1925_v43 = vpack.c.bf16 %v1026_v61, %v1024_v36  ;;  %v1046_v6 = vadd.f32 %v1045_v13, %v2970_v58 }
 0x3f1   : > { %v2166_v3 = vpop.eup %2165 }
 0x3f2   : > { %v1028_v54 = vmul.f32 %v2166_v3, %v2876_v18  ;;  %1924 = vmatprep.subr.bf16.mxu0 %v1923_v10  ;;  %v983_v46 = vpop.xlane.xlu1 %982  ;;  %v1029_v52 = vmul.f32 %v2166_v3, %v2878_v38  ;;  %v1067_v18 = vadd.f32 %v1066_v25, %v2973_v26  ;;  %v1047_v17 = vadd.f32 %v1046_v6, %v1018_v2 }
 0x3f3   : > { %2171 = vrcp.f32 %v983_v46  ;;  %1926 = vmatpush1.bf16.msra.mxu0 %v1925_v43 }
 0x3f4   : > { %1132 = vst [vmem:[%s2949_s27 + $0x80] sm:$0xff] %v1028_v54  ;;  %1133 = vst [vmem:[%s2949_s27 + $0x88] sm:$0xff] %v1029_v52  ;;  %v1068_v50 = vadd.f32 %v1067_v18, %v1019_v60  ;;  %v1048_v8 = vadd.f32 %v1047_v17, %v1020_v30 }
 0x3f5   : > { %v2168_v55 = vpop.eup %2167 }
 0x3f6   : > { %v1030_v48 = vmul.f32 %v2168_v55, %v2884_v21  ;;  %v986_v38 = vpop.xlane.xlu1 %985  ;;  %v1031_v56 = vmul.f32 %v2168_v55, %v2886_v44  ;;  %v1069_v9 = vadd.f32 %v1068_v50, %v1021_v63  ;;  %v1049_v44 = vadd.f32 %v1048_v8, %v1022_v57 }
 0x3f7   : > { %2173 = vrcp.f32 %v986_v38  ;;  %v1093_v8 = vlaneseq }
 0x3f8   : > { %1134 = vst [vmem:[%s2949_s27 + $0x90] sm:$0xff] %v1030_v48  ;;  %1135 = vst [vmem:[%s2949_s27 + $0x98] sm:$0xff] %v1031_v56  ;;  %v1927_v45 = vpack.c.bf16 %v1031_v56, %v1029_v52  ;;  %v1929_v23 = vpack.c.bf16 %v1030_v48, %v1028_v54  ;;  %v1070_v2 = vadd.f32 %v1069_v9, %v1023_v34 }
 0x3f9   : > { %v2170_v51 = vpop.eup %2169  ;;  %v1050_v35 = vadd.f32 %v1049_v44, %v1024_v36  ;;  %vm1108_vm2 = vcmp.lt.s32.totalorder %v1093_v8, 256 }
 0x3fa   : > { %v1032_v58 = vmul.f32 %v2170_v51, %v2892_v24  ;;  %v989_v26 = vpop.xlane.xlu0 %988  ;;  %1928 = vmatprep.subr.bf16.mxu0 %v1927_v45  ;;  %v1033_v21 = vmul.f32 %v2170_v51, %v2894_v47  ;;  %v1071_v11 = vadd.f32 %v1070_v2, %v1025_v62  ;;  %v2392_v45 = vmov 1966171168  }
 0x3fb   : > { %2175 = vrcp.f32 %v989_v26  ;;  %1930 = vmatpush1.bf16.msra.mxu0 %v1929_v23  ;;  %v1051_v14 = vadd.f32 %v1050_v35, %v1026_v61  ;;  %v1091_v23 = vunpack.c.l.s4 %v2392_v45 }
 0x3fc   : > { %1136 = vst [vmem:[%s2949_s27 + $0xa0] sm:$0xff] %v1032_v58  ;;  %1137 = vst [vmem:[%s2949_s27 + $0xa8] sm:$0xff] %v1033_v21  ;;  %v1072_v47 = vadd.f32 %v1071_v11, %v1027_v42 }
 0x3fd   : > { %v2172_v60 = vpop.eup %2171  ;;  %v1052_v12 = vadd.f32 %v1051_v14, %v1028_v54  ;;  %v1092_v26 = vunpack.c.0.s8 %v1091_v23 }
 0x3fe   : > { %v1034_v53 = vmul.f32 %v2172_v60, %v2900_v27  ;;  %v992_v30 = vpop.xlane.xlu1 %991  ;;  %v1035_v24 = vmul.f32 %v2172_v60, %v2902_v5  ;;  %v1073_v4 = vadd.f32 %v1072_v47, %v1029_v52  ;;  %v1094_v60 = vshrl.u32 %v1093_v8, 7  ;;  %v1044_v47 = vld [vmem:[#allocation3] sm:$0x3] }
 0x3ff   : > { %2177 = vrcp.f32 %v992_v30  ;;  %v1053_v5 = vadd.f32 %v1052_v12, %v1030_v48 }
 0x400   : > { %1138 = vst [vmem:[%s2949_s27 + $0xb0] sm:$0xff] %v1034_v53  ;;  %1139 = vst [vmem:[%s2949_s27 + $0xb8] sm:$0xff] %v1035_v24  ;;  %v1931_v63 = vpack.c.bf16 %v1035_v24, %v1033_v21  ;;  %v1933_v41 = vpack.c.bf16 %v1034_v53, %v1032_v58  ;;  %v1074_v49 = vadd.f32 %v1073_v4, %v1031_v56 }
 0x401   : > { %v2174_v57 = vpop.eup %2173  ;;  %v1054_v37 = vadd.f32 %v1053_v5, %v1032_v58  ;;  %v1095_v30 = vsub.s32 %v1092_v26, %v1094_v60 }
 0x402   : > { %v1036_v34 = vmul.f32 %v2174_v57, %v2908_v31  ;;  %v995_v28 = vpop.xlane.xlu0 %994  ;;  %1932 = vmatprep.subr.bf16.mxu0 %v1931_v63  ;;  %v1037_v27 = vmul.f32 %v2174_v57, %v2910_v15  ;;  %v1075_v7 = vadd.f32 %v1074_v49, %v1033_v21  ;;  %v1155_v18 = vpop.permute.xlu1 %1154  ;;  %v1243_v57 = vld [vmem:[#allocation2] sm:$0xff] }
 0x403   : > { %2179 = vrcp.f32 %v995_v28  ;;  %1934 = vmatpush1.bf16.msra.mxu0 %v1933_v41  ;;  %v1055_v61 = vadd.f32 %v1054_v37, %v1034_v53  ;;  %v1235_v50 = vadd.f32 %v2940_v40, %v1155_v18  ;;  %v1245_v28 = vld [vmem:[#allocation2 + $0x10] sm:$0xff] }
 0x404   : > { %1140 = vst [vmem:[%s2949_s27 + $0xc0] sm:$0xff] %v1036_v34  ;;  %1141 = vst [vmem:[%s2949_s27 + $0xc8] sm:$0xff] %v1037_v27  ;;  %v1076_v20 = vadd.f32 %v1075_v7, %v1035_v24 }
 0x405   : > { %v2176_v36 = vpop.eup %2175  ;;  %v1056_v43 = vadd.f32 %v1055_v61, %v1036_v34 }
 0x406   : > { %v1038_v62 = vmul.f32 %v2176_v36, %v2914_v19  ;;  %v1039_v31 = vmul.f32 %v2176_v36, %v2916_v33  ;;  %v1077_v54 = vadd.f32 %v1076_v20, %v1037_v27 }
 0x408   : > { %1142 = vst [vmem:[%s2949_s27 + $0xd0] sm:$0xff] %v1038_v62  ;;  %1143 = vst [vmem:[%s2949_s27 + $0xd8] sm:$0xff] %v1039_v31  ;;  %v1935_v15 = vpack.c.bf16 %v1039_v31, %v1037_v27  ;;  %v1937_v42 = vpack.c.bf16 %v1038_v62, %v1036_v34  ;;  %v1057_v46 = vadd.f32 %v1056_v43, %v1038_v62  ;;  %v1246_v27 = vld [vmem:[#allocation2 + $0x18] sm:$0xff] }
 0x409   : > { %v2178_v10 = vpop.eup %2177  ;;  %v1078_v33 = vadd.f32 %v1077_v54, %v1039_v31 }
 0x40a   : > { %v1040_v3 = vmul.f32 %v2178_v10, %v2920_v22  ;;  %1936 = vmatprep.subr.bf16.mxu0 %v1935_v15  ;;  %v1041_v19 = vmul.f32 %v2178_v10, %v2922_v59 }
 0x40b   : > { %1938 = vmatpush1.bf16.msra.mxu0 %v1937_v42 }
 0x40c   : > { %1144 = vst [vmem:[%s2949_s27 + $0xe0] sm:$0xff] %v1040_v3  ;;  %1145 = vst [vmem:[%s2949_s27 + $0xe8] sm:$0xff] %v1041_v19  ;;  %v1058_v13 = vadd.f32 %v1057_v46, %v1040_v3  ;;  %v1079_v6 = vadd.f32 %v1078_v33, %v1041_v19 }
 0x40d   : > { %v2180_v52 = vpop.eup %2179 }
 0x40e   : > { %v1042_v25 = vmul.f32 %v2180_v52, %v2926_v32  ;;  %v1043_v55 = vmul.f32 %v2180_v52, %v2928_v16  ;;  %v1160_v16 = vpop.permute.xlu0 %1159 }
 0x40f   : > { %v1240_v44 = vadd.f32 %v2938_v39, %v1160_v16 }
 0x410   : > { %v1059_v22 = vadd.f32 %v1058_v13, %v1042_v25  ;;  %1146 = vst [vmem:[%s2949_s27 + $0xf0] sm:$0xff] %v1042_v25  ;;  %v1080_v48 = vadd.f32 %v1079_v6, %v1043_v55  ;;  %1147 = vst [vmem:[%s2949_s27 + $0xf8] sm:$0xff] %v1043_v55  ;;  %v1939_v38 = vpack.c.bf16 %v1043_v55, %v1041_v19 }
 0x411   : > { %v1941_v56 = vpack.c.bf16 %v1042_v25, %v1040_v3 }
 0x412   : > { %v1060_v59 = vrot.slane %v1059_v22, 4  ;;  %v1081_v17 = vrot.slane %v1080_v48, 4  ;;  %1940 = vmatprep.subr.bf16.mxu0 %v1939_v38 }
 0x413   : > { %1942 = vmatpush1.bf16.msra.mxu0 %v1941_v56 }
 0x414   : > { %v1061_v51 = vadd.f32 %v1060_v59, %v1059_v22  ;;  %v1082_v32 = vadd.f32 %v1081_v17, %v1080_v48 }
 0x416   : > { %v1062_v9 = vrot.slane %v1061_v51, 2  ;;  %v1083_v58 = vrot.slane %v1082_v32, 2  ;;  %1312 = vmatmul.mubr.f32.vlgmr.msra.gmra.mrb[16].mxu0 %v1235_v50 }
 0x417   : > { %1317 = vmatprep.mubr.f32.mxu0 %v2390_v29  ;;  %v1244_v29 = vld [vmem:[#allocation2 + $0x8] sm:$0xff] }
 0x418   : > { %v1063_v21 = vadd.f32 %v1062_v9, %v1061_v51  ;;  %v1084_v2 = vadd.f32 %v1083_v58, %v1082_v32 }
 0x41a   : > { %v1064_v35 = vrot.slane %v1063_v21, 1  ;;  %v1085_v40 = vrot.slane %v1084_v2, 1  ;;  %1318 = vmatmul.mubr.f32.gmra.mrb[18].mxu0 %v1240_v44 }
 0x41c   : > { %v1065_v11 = vadd.f32 %v1064_v35, %v1063_v21  ;;  %v1086_v53 = vadd.f32 %v1085_v40, %v1084_v2 }
 0x41e   : > { %v1089_v24 = vcombine.low %v1065_v11, %v1086_v53 }
 0x420   : > { %v1096_v14 = vrot.slane %v1089_v24, %v1095_v30 }
 0x422   : > { %v1103_v63 = vrot.slane %v1096_v14, %v1095_v30 }
 0x424   : > { %v1105_v41 = vadd.f32 %v1103_v63, %v1044_v47 }
 0x426   : > { %1110 = vst.msk [vmem:[#allocation3] sm:$0x3] %vm1108_vm2, %v1105_v41 }
 0x4e9   : > { %v1313_v12 = vpop.f32.mrb[16].mxu0 }
 0x4ea   : > { %v1324_v34 = vadd.f32 %v1313_v12, %v1243_v57  ;;  %v1315_v39 = vpop.f32.mrb[17].mxu0 }
 0x4eb   : > { %v1325_v4 = vadd.f32 %v1315_v39, %v1244_v29 }
 0x4ec   : > { %1328 = vst [vmem:[#allocation2] sm:$0xff] %v1324_v34 }
 0x4ed   : > { %1329 = vst [vmem:[#allocation2 + $0x8] sm:$0xff] %v1325_v4  ;;  %v1319_v5 = vpop.f32.mrb[18].mxu0 }
 0x4ee   : > { %v1326_v49 = vadd.f32 %v1319_v5, %v1245_v28  ;;  %v1321_v36 = vpop.f32.mrb[19].mxu0 }
 0x4ef   : > { %v1327_v37 = vadd.f32 %v1321_v36, %v1246_v27 }
 0x4f0   : > { %1330 = vst [vmem:[#allocation2 + $0x10] sm:$0xff] %v1326_v49 }
 0x4f1   : > { %1331 = vst [vmem:[#allocation2 + $0x18] sm:$0xff] %v1327_v37 }
 0x4f2 PF: > { %p1332_p0 = scmp.eq.s32.totalorder %s2364_s8, 1 }
 0x4f4   : > { %p1333_p3 = pnand %p1332_p0, %p346_p1 }
 0x4f5   : > { %v1337_v62 = vld [vmem:[#allocation3] sm:$0x3] (!%p1333_p3)  ;;  %v1340_v31 = vlaneseq (!%p1333_p3) }
 0x4f6   : > { %1336 = sbr.rel (%p1333_p3) target bundleno = 1284 (0x504), region = 60  ;;  %v1338_v7 = vadd.f32 (!%p1333_p3), 1e-09, %v1337_v62 }
 0x4f7   : > { %vm1342_vm3 = vcmp.lt.s32.totalorder (!%p1333_p3), %v1340_v31, 256 }
 0x4f8   : > { %2181 = vrcp.f32 (!%p1333_p3), %v1338_v7 }
 0x502   : > { %v2182_v61 = vpop.eup %2181 }
 0x503   : > { %1344 = vst.msk [vmem:[#allocation3] sm:$0x3] %vm1342_vm3, %v2182_v61 }
 0x504 PF: > { %p1810_p8 = scmp.ne.s32.totalorder %s2364_s8, 1 }
 0x505   : > { %s1349_s22 = sshra.s32 (!%p1810_p8), %s2610_s7, 3  ;;  %v1387_v20 = vlaneseq (!%p1810_p8)  ;;  %s3338_s4 = sld [smem:[#allocation24_spill]] (!%p1810_p8)  ;;  %vm1491_vm4 = vcmask (!%p1810_p8), 130048   ;;  %v2393_v19 = vmov (!%p1810_p8), 0  }
 0x506   : > { %1347 = sbr.rel (%p1810_p8) target bundleno = 1524 (0x5f4), region = 64  ;;  %s1829_s14 = sshll.u32 (!%p1810_p8), %s1349_s22, 4  ;;  %2183 = vset.pattern.permute.xlu0 (!%p1810_p8), %v2393_v19 }
 0x507   : > { %s1461_s24 = scalar_lea.vmem (!%p1810_p8), [#allocation3], %s339_s19  ;;  %v1388_v43 = vshrl.u32 (!%p1810_p8), %v1387_v20, 7  ;;  %s1464_s27 = scalar_lea.vmem (!%p1810_p8), [#allocation2], %s2619_s15 }
 0x508   : > { %v1465_v3 = vld [vmem:[%s1464_s27] sm:$0xff] (!%p1810_p8)  ;;  %v1466_v54 = vld [vmem:[%s1464_s27 + $0x10] sm:$0xff] (!%p1810_p8)  ;;  %s3339_s5 = sld [smem:[#allocation25_spill]] (!%p1810_p8)  ;;  %s3057_s18 = scalar_lea.vmem (!%p1810_p8), [#allocation4], %s1829_s14 }
 0x509   : > { %v1354_v33 = vld [vmem:[%s3057_s18] sm:$0xff] (!%p1810_p8)  ;;  %v1355_v52 = vld [vmem:[%s3057_s18 + $0x8] sm:$0xff] (!%p1810_p8)  ;;  %v1356_v13 = vld [vmem:[%s3057_s18 + $0x10] sm:$0xff] (!%p1810_p8)  ;;  %v1389_v48 = vsub.s32 (!%p1810_p8), 0, %v1388_v43  ;;  %v1393_v38 = vsub.s32 (!%p1810_p8), 1, %v1388_v43 }
 0x50a   : > { %v1348_v42 = vld [vmem:[#allocation3] sm:$0x3] (!%p1810_p8)  ;;  %v1357_v6 = vld [vmem:[%s3057_s18 + $0x18] sm:$0xff] (!%p1810_p8)  ;;  %v1359_v22 = vld [vmem:[%s3057_s18 + $0x28] sm:$0xff] (!%p1810_p8) }
 0x50b   : > { %v1475_v15 = vld [vmem:[%s3338_s4] sm:$0xff] (!%p1810_p8)  ;;  %v1360_v56 = vld [vmem:[%s3057_s18 + $0x30] sm:$0xff] (!%p1810_p8)  ;;  %v1361_v59 = vld [vmem:[%s3057_s18 + $0x38] sm:$0xff] (!%p1810_p8)  ;;  %v3073_v8 = vrot.slane (!%p1810_p8), %v1348_v42, %v1389_v48  ;;  %v3075_v16 = vrot.slane (!%p1810_p8), %v1348_v42, %v1393_v38 }
 0x50c   : > { %v1814_v10 = vld [vmem:[%s1461_s24] ss:$0 sm:$0xff] (!%p1810_p8)  ;;  %1896 = vmatprep.mubr.msk.f32.mxu0 (!%p1810_p8), %vm1491_vm4, %v1475_v15  ;;  %v1363_v23 = vld [vmem:[%s3057_s18 + $0x48] sm:$0xff] (!%p1810_p8)  ;;  %v1364_v51 = vld [vmem:[%s3057_s18 + $0x50] sm:$0xff] (!%p1810_p8) }
 0x50d   : > { %v1473_v25 = vmul.f32 %v1814_v10, %v1465_v3  ;;  %v1474_v55 = vmul.f32 %v1814_v10, %v1466_v54  ;;  %v1358_v18 = vld [vmem:[%s3057_s18 + $0x20] sm:$0xff]  ;;  %v1365_v32 = vld [vmem:[%s3057_s18 + $0x58] sm:$0xff]  ;;  %v1367_v58 = vld [vmem:[%s3057_s18 + $0x68] sm:$0xff]  ;;  %v1397_v35 = vmul.f32 %v3073_v8, %v1354_v33  ;;  %v1398_v40 = vmul.f32 %v3075_v16, %v1355_v52 }
 0x50e   : > { %v1479_v46 = vld [vmem:[%s3339_s5] sm:$0xff]  ;;  %v1368_v26 = vld [vmem:[%s3057_s18 + $0x70] sm:$0xff]  ;;  %v1369_v44 = vld [vmem:[%s3057_s18 + $0x78] sm:$0xff]  ;;  %v1399_v11 = vmul.f32 %v3073_v8, %v1356_v13  ;;  %v1400_v53 = vmul.f32 %v3075_v16, %v1357_v6  ;;  %v1401_v63 = vmul.f32 %v3073_v8, %v1358_v18  ;;  %v1402_v41 = vmul.f32 %v3075_v16, %v1359_v22 }
 0x50f   : > { %1483 = vperm.xlu0 %2183, %v1479_v46   ;;  %v1362_v17 = vld [vmem:[%s3057_s18 + $0x40] sm:$0xff]  ;;  %v1477_v50 = vsub.f32 %v2626_v0, %v1473_v25  ;;  %v1478_v45 = vsub.f32 %v2628_v1, %v1474_v55  ;;  %v1371_v60 = vld [vmem:[%s3057_s18 + $0x88] sm:$0xff]  ;;  %v1372_v24 = vld [vmem:[%s3057_s18 + $0x90] sm:$0xff]  ;;  %v1403_v57 = vmul.f32 %v3073_v8, %v1360_v56  ;;  %v1404_v29 = vmul.f32 %v3075_v16, %v1361_v59 }
 0x510   : > { %v1366_v9 = vld [vmem:[%s3057_s18 + $0x60] sm:$0xff]  ;;  %v1476_v30 = vld [vmem:[%s3338_s4 + $0x8] sm:$0xff]  ;;  %v1373_v14 = vld [vmem:[%s3057_s18 + $0x98] sm:$0xff]  ;;  %v1405_v4 = vmul.f32 %v3073_v8, %v1362_v17  ;;  %v1406_v28 = vmul.f32 %v3075_v16, %v1363_v23  ;;  %v1407_v27 = vmul.f32 %v3073_v8, %v1364_v51  ;;  %v1408_v5 = vmul.f32 %v3075_v16, %v1365_v32  ;;  %1429 = vst [vmem:[%s2634_s10] sm:$0xff] %v1397_v35 }
 0x511   : > { %v1943_v21 = vpack.c.bf16 %v1478_v45, %v1477_v50  ;;  %v1370_v2 = vld [vmem:[%s3057_s18 + $0x80] sm:$0xff]  ;;  %v1375_v12 = vld [vmem:[%s3057_s18 + $0xa8] sm:$0xff]  ;;  %v1376_v34 = vld [vmem:[%s3057_s18 + $0xb0] sm:$0xff]  ;;  %1430 = vst [vmem:[%s2634_s10 + $0x8] sm:$0xff] %v1398_v40  ;;  %v1409_v62 = vmul.f32 %v3073_v8, %v1366_v9  ;;  %v1410_v7 = vmul.f32 %v3075_v16, %v1367_v58  ;;  %v1411_v31 = vmul.f32 %v3073_v8, %v1368_v26 }
 0x512   : > { %v1374_v47 = vld [vmem:[%s3057_s18 + $0xa0] sm:$0xff]  ;;  %v1377_v39 = vld [vmem:[%s3057_s18 + $0xb8] sm:$0xff]  ;;  %1431 = vst [vmem:[%s2634_s10 + $0x10] sm:$0xff] %v1399_v11  ;;  %1432 = vst [vmem:[%s2634_s10 + $0x18] sm:$0xff] %v1400_v53  ;;  %v1412_v61 = vmul.f32 %v3075_v16, %v1369_v44  ;;  %v1413_v10 = vmul.f32 %v3073_v8, %v1370_v2  ;;  %v1414_v43 = vmul.f32 %v3075_v16, %v1371_v60 }
 0x513   : > { %1944 = vmatprep.subr.bf16.mxu0 %v1943_v21  ;;  %v1378_v49 = vld [vmem:[%s3057_s18 + $0xc0] sm:$0xff]  ;;  %v1379_v36 = vld [vmem:[%s3057_s18 + $0xc8] sm:$0xff]  ;;  %v1380_v37 = vld [vmem:[%s3057_s18 + $0xd0] sm:$0xff]  ;;  %1433 = vst [vmem:[%s2634_s10 + $0x20] sm:$0xff] %v1401_v63  ;;  %v1415_v3 = vmul.f32 %v3073_v8, %v1372_v24  ;;  %v1416_v54 = vmul.f32 %v3075_v16, %v1373_v14  ;;  %v1417_v33 = vmul.f32 %v3073_v8, %v1374_v47 }
 0x514   : > { %1946 = vmatpush3.bf16.msra.mxu0 %v1943_v21  ;;  %1434 = vst [vmem:[%s2634_s10 + $0x28] sm:$0xff] %v1402_v41  ;;  %1435 = vst [vmem:[%s2634_s10 + $0x30] sm:$0xff] %v1403_v57  ;;  %v1381_v20 = vld [vmem:[%s3057_s18 + $0xd8] sm:$0xff]  ;;  %v1382_v15 = vld [vmem:[%s3057_s18 + $0xe0] sm:$0xff]  ;;  %v1418_v52 = vmul.f32 %v3075_v16, %v1375_v12  ;;  %v1419_v13 = vmul.f32 %v3073_v8, %v1376_v34  ;;  %v1420_v25 = vmul.f32 %v3075_v16, %v1377_v39 }
 0x515   : > { %1436 = vst [vmem:[%s2634_s10 + $0x38] sm:$0xff] %v1404_v29  ;;  %v1383_v42 = vld [vmem:[%s3057_s18 + $0xe8] sm:$0xff]  ;;  %1437 = vst [vmem:[%s2634_s10 + $0x40] sm:$0xff] %v1405_v4  ;;  %v1384_v19 = vld [vmem:[%s3057_s18 + $0xf0] sm:$0xff]  ;;  %v1421_v6 = vmul.f32 %v3073_v8, %v1378_v49  ;;  %v1422_v18 = vmul.f32 %v3075_v16, %v1379_v36  ;;  %v1423_v22 = vmul.f32 %v3073_v8, %v1380_v37 }
 0x516   : > { %1438 = vst [vmem:[%s2634_s10 + $0x48] sm:$0xff] %v1406_v28  ;;  %1439 = vst [vmem:[%s2634_s10 + $0x50] sm:$0xff] %v1407_v27  ;;  %v1385_v46 = vld [vmem:[%s3057_s18 + $0xf8] sm:$0xff]  ;;  %v1480_v55 = vld [vmem:[%s3339_s5 + $0x8] sm:$0xff]  ;;  %v1424_v48 = vmul.f32 %v3075_v16, %v1381_v20  ;;  %v1425_v38 = vmul.f32 %v3073_v8, %v1382_v15  ;;  %v1426_v56 = vmul.f32 %v3075_v16, %v1383_v42 }
 0x517   : > { %1440 = vst [vmem:[%s2634_s10 + $0x58] sm:$0xff] %v1408_v5  ;;  %1441 = vst [vmem:[%s2634_s10 + $0x60] sm:$0xff] %v1409_v62  ;;  %1897 = vmatmul.mubr.msk.f32.vlgmr.msra.gmra.mrb[0].mxu0 %vm1491_vm4, %v1476_v30  ;;  %1488 = vperm.xlu0 %2183, %v1480_v55   ;;  %v1427_v59 = vmul.f32 %v3073_v8, %v1384_v19  ;;  %v1428_v17 = vmul.f32 %v3075_v16, %v1385_v46 }
 0x518   : > { %1442 = vst [vmem:[%s2634_s10 + $0x68] sm:$0xff] %v1410_v7  ;;  %1443 = vst [vmem:[%s2634_s10 + $0x70] sm:$0xff] %v1411_v31 }
 0x519   : > { %1444 = vst [vmem:[%s2634_s10 + $0x78] sm:$0xff] %v1412_v61  ;;  %1445 = vst [vmem:[%s2634_s10 + $0x80] sm:$0xff] %v1413_v10 }
 0x51a   : > { %1446 = vst [vmem:[%s2634_s10 + $0x88] sm:$0xff] %v1414_v43  ;;  %1447 = vst [vmem:[%s2634_s10 + $0x90] sm:$0xff] %v1415_v3 }
 0x51b   : > { %1448 = vst [vmem:[%s2634_s10 + $0x98] sm:$0xff] %v1416_v54  ;;  %1449 = vst [vmem:[%s2634_s10 + $0xa0] sm:$0xff] %v1417_v33 }
 0x51c   : > { %1450 = vst [vmem:[%s2634_s10 + $0xa8] sm:$0xff] %v1418_v52  ;;  %1451 = vst [vmem:[%s2634_s10 + $0xb0] sm:$0xff] %v1419_v13 }
 0x51d   : > { %1452 = vst [vmem:[%s2634_s10 + $0xb8] sm:$0xff] %v1420_v25  ;;  %1453 = vst [vmem:[%s2634_s10 + $0xc0] sm:$0xff] %v1421_v6 }
 0x51e   : > { %1454 = vst [vmem:[%s2634_s10 + $0xc8] sm:$0xff] %v1422_v18  ;;  %1455 = vst [vmem:[%s2634_s10 + $0xd0] sm:$0xff] %v1423_v22 }
 0x51f   : > { %1456 = vst [vmem:[%s2634_s10 + $0xd8] sm:$0xff] %v1424_v48  ;;  %1457 = vst [vmem:[%s2634_s10 + $0xe0] sm:$0xff] %v1425_v38 }
 0x520   : > { %1458 = vst [vmem:[%s2634_s10 + $0xe8] sm:$0xff] %v1426_v56  ;;  %1459 = vst [vmem:[%s2634_s10 + $0xf0] sm:$0xff] %v1427_v59 }
 0x521   : > { %1460 = vst [vmem:[%s2634_s10 + $0xf8] sm:$0xff] %v1428_v17 }
 0x58e   : > { %v1484_v50 = vpop.permute.xlu0 %1483 }
 0x596   : > { %v1489_v45 = vpop.permute.xlu0 %1488 }
 0x5ea   : > { %v1898_v23 = vpop.f32.mrb[0].mxu0 }
 0x5eb   : > { %v1570_v51 = vadd.f32 %v1898_v23, %v1489_v45  ;;  %v1564_v32 = vpop.f32.mrb[1].mxu0 }
 0x5ec   : > { %v1565_v8 = vadd.f32 %v1564_v32, %v1484_v50 }
 0x5ed   : > { %vm1574_vm5 = vcmp.ge.f32.partialorder %v1570_v51, 0.0  ;;  %v1576_v16 = vmul.f32 0.1, %v1570_v51 }
 0x5ee   : > { %vm1573_vm6 = vcmp.ge.f32.partialorder %v1565_v8, 0.0  ;;  %v1575_v9 = vmul.f32 0.1, %v1565_v8 }
 0x5ef   : > { %v1578_v58 = vsel %vm1574_vm5, %v1570_v51, %v1576_v16 }
 0x5f0   : > { %v1580_v26 = vadd.f32 %v1578_v58, %v2628_v1  ;;  %v1577_v21 = vsel %vm1573_vm6, %v1565_v8, %v1575_v9 }
 0x5f1   : > { %v1579_v44 = vadd.f32 %v1577_v21, %v2626_v0 }
 0x5f2   : > { %1582 = vst [vmem:[%s2632_s20 + $0x8] sm:$0xff] %v1580_v26 }
 0x5f3   : > { %1581 = vst [vmem:[%s2632_s20] sm:$0xff] %v1579_v44 }
 0x5f4 PF: > { %s3174_s15 = smul.u32 %s2360_s30, %s2364_s8  ;;  %s1819_s22 = sshll.u32 %s2368_s9, 2 }
 0x5f5   : > { %s1604_s6 = sshll.u32 %s2632_s20, 4  ;;  %s3340_s0 = sld [smem:[#allocation26_spill]]  ;;  %s3179_s6 = int_to_ptr.vmem [resolvable:$true] %s1604_s6 }
 0x5f6   : > { %s1601_s14 = sadd.s32 %s1819_s22, %s3174_s15  ;;  %s1584_s7 = scalar_lea.sflag [#allocation7], %s2613_s11 }
 0x5f7   : > { %s1820_s24 = sshll.u32 %s1601_s14, 7  ;;  %s2214_s19 = scalar_lea.vmem %s3179_s6, 256 }
 0x5f8   : > { %p2215_p10 = scmp.ne.s32.totalorder %s3179_s6, %s2214_s19  ;;  %p3341_p6 = scmp.ne.s32.totalorder %s3330_s17, 0 }
 0x5f9   : > { %s2394_s30 = smov [#allocation8]  }
 0x5fa   : > { %p2216_p12 = pnand %p2215_p10, %p3341_p6  ;;  %s2218_s8 = sshll.u32 %s2394_s30, 4  ;;  %s2219_s8 = int_to_ptr.vmem [resolvable:$false] %s2218_s8 }
 0x5fb   : > { %s3184_s1 = scalar_lea.hbm %s3340_s0, %s1820_s24  ;;  %s2220_s20 = scalar_lea.vmem %s2219_s8, 512 }
 0x5fc   : > { %p2217_p13 = pneg %p2216_p12  ;;  %p2221_p5 = scmp.lt.s32.totalorder %s3179_s6, %s2219_s8 }
 0x5fd   : > { %p2222_p9 = scmp.lt.s32.totalorder %s2220_s20, %s2214_s19 }
 0x5ff   : > { %p2223_p11 = por %p2222_p9, %p2221_p5 }
 0x601   : > { %p2224_p7 = pnand %p2223_p11, %p2217_p13 }
 0x603   : > { %2227 = shalt.err (!%p2224_p7)
}
 0x604   : > { %s2228_s22 = scalar_lea.hbm %s3184_s1, 256  ;;  %s2232_s27 = scalar_lea.hbm %s3340_s0, 1024 }
 0x605   : > { %p2229_p1 = scmp.ne.s32.totalorder %s3184_s1, %s2228_s22  ;;  %p2233_p0 = scmp.lt.u32.totalorder %s3184_s1, %s3340_s0 }
 0x606   : > { %p2234_p3 = scmp.lt.u32.totalorder %s2232_s27, %s2228_s22  ;;  %p2236_p10 = scmp.lt.u32.totalorder %s2228_s22, %s3184_s1 }
 0x607   : > { %p2230_p2 = pnand %p2229_p1, %p3341_p6 }
 0x608   : > { %p2235_p8 = por %p2234_p3, %p2233_p0 }
 0x609   : > { %p2231_p4 = pneg %p2230_p2 }
 0x60a   : > { %p2237_p12 = por %p2236_p10, %p2235_p8 }
 0x60c   : > { %p2238_p13 = pnand %p2237_p12, %p2231_p4 }
 0x60e   : > { %2241 = shalt.err (!%p2238_p13)
}
 0x60f   : > { %s2395_s19 = smov 128   ;;  %s2396_s8 = smov 256  }
 0x610   : > { %s2397_s20 = smov 8   ;;  %s1830_s22 = sshll.u32 %s3174_s15, 5 }
 0x611   : > { %1951 = dma.vmem_to_hbm [thread:$0]  (%p3341_p6), %s3179_s6, 256, %s3184_s1, %s1584_s7, %s2395_s19, %s2396_s8, %s2397_s20  }
 0x612   : > { %s1823_s14 = sshll.u32 %s2368_s9, 6  ;;  %s1624_s27 = sshll.u32 %s2634_s10, 4  ;;  %s3214_s27 = int_to_ptr.vmem [resolvable:$true] %s1624_s27 }
 0x613   : > { %s1621_s24 = sadd.s32 %s1830_s22, %s1823_s14  ;;  %s3342_s2 = sld [smem:[#allocation27_spill]] }
 0x614   : > { %s1824_s18 = sshll.u32 %s1621_s24, 7  ;;  %s1589_s4 = scalar_lea.sflag [#allocation10], %s2613_s11 }
 0x615   : > { %s2242_s5 = scalar_lea.vmem %s3214_s27, 4096  ;;  %s2398_s9 = smov [#allocation9]  }
 0x616   : > { %p2243_p5 = scmp.ne.s32.totalorder %s3214_s27, %s2242_s5  ;;  %s2246_s15 = sshll.u32 %s2398_s9, 4  ;;  %s2247_s15 = int_to_ptr.vmem [resolvable:$false] %s2246_s15 }
 0x617   : > { %s2248_s10 = scalar_lea.vmem %s2247_s15, 8192  ;;  %p2249_p7 = scmp.lt.s32.totalorder %s3214_s27, %s2247_s15 }
 0x618   : > { %p2244_p9 = pnand %p2243_p5, %p3341_p6  ;;  %p2250_p1 = scmp.lt.s32.totalorder %s2248_s10, %s2242_s5 }
 0x619   : > { %s3219_s3 = scalar_lea.hbm %s3342_s2, %s1824_s18 }
 0x61a   : > { %p2245_p11 = pneg %p2244_p9  ;;  %p2251_p2 = por %p2250_p1, %p2249_p7 }
 0x61c   : > { %p2252_p4 = pnand %p2251_p2, %p2245_p11 }
 0x61e   : > { %2255 = shalt.err (!%p2252_p4)
}
 0x61f   : > { %s2256_s6 = scalar_lea.hbm %s3219_s3, 4096  ;;  %s2260_s7 = scalar_lea.hbm %s3342_s2, 16384 }
 0x620   : > { %p2257_p0 = scmp.ne.s32.totalorder %s3219_s3, %s2256_s6  ;;  %p2261_p10 = scmp.lt.u32.totalorder %s3219_s3, %s3342_s2 }
 0x621   : > { %p2262_p12 = scmp.lt.u32.totalorder %s2260_s7, %s2256_s6  ;;  %p2264_p5 = scmp.lt.u32.totalorder %s2256_s6, %s3219_s3 }
 0x622   : > { %p2258_p3 = pnand %p2257_p0, %p3341_p6 }
 0x623   : > { %p2263_p13 = por %p2262_p12, %p2261_p10 }
 0x624   : > { %p2259_p8 = pneg %p2258_p3 }
 0x625   : > { %p2265_p9 = por %p2264_p5, %p2263_p13 }
 0x627   : > { %p2266_p11 = pnand %p2265_p9, %p2259_p8 }
 0x629   : > { %2269 = shalt.err (!%p2266_p11)
}
 0x62a   : > { %s2399_s5 = smov 16  }
 0x62b   : > { %1952 = dma.vmem_to_hbm [thread:$0]  (%p3341_p6), %s3214_s27, 4096, %s3219_s3, %s1589_s4, %s2396_s8, %s2396_s8, %s2399_s5  }
 0x62c PF: > { %s3343_s22 = sld [smem:[#allocation14_spill]]  ;;  %p1967_p7 = scmp.ge.s32.totalorder %s2384_s13, 2 }
 0x62d   : > { %p3344_p1 = scmp.ne.s32.totalorder %s3331_s23, 0 }
 0x62f   : > { %p1960_p2 = pnand %p1967_p7, %p3344_p1 }
 0x632   : > { %s1639_s14 = sand.u32 1, %s3343_s22  }
 0x633   : > { %s1640_s24 = scalar_lea.sflag [#allocation7], %s1639_s14 }
 0x634   : > { %2327 = dma.done.wait (!%p1960_p2), %s1640_s24, 256  }
 0x635   : > { %2329 = vsyncadd (!%p1960_p2), %s1640_s24, 4294967040  ;;  %s1649_s18 = scalar_lea.sflag [#allocation10], %s1639_s14 }
 0x636   : > { %2331 = dma.done.wait (!%p1960_p2), %s1649_s18, 4096  }
 0x637   : > { %2333 = vsyncadd (!%p1960_p2), %s1649_s18, 4294963200  ;;  %s27_s13 = sadd.s32 1, %s2384_s13   ;;  %s3346_s30 = sld [smem:[#allocation15_spill]] }
 0x638   : > { %p3252_p4 = scmp.ge.s32.totalorder %s27_s13, 10   ;;  %s3347_s8 = sld [smem:[#allocation16_spill]] }
 0x639   : > { %s3348_s10 = sld [smem:[#allocation17_spill]]  ;;  %s3349_s11 = sld [smem:[#allocation18_spill]] }
 0x63a   : > { %s3350_s3 = sld [smem:[#allocation19_spill]]  ;;  %s3351_s24 = smov %s2340_s25 }
 0x63b   : > { %s3352_s25 = smov %s2344_s26  ;;  %s3353_s26 = smov %s2548_s21 }
 0x63c   : > { %s3354_s27 = smov %s2352_s28  ;;  %s3355_s28 = smov %s2356_s29 }
 0x63d   : > { %s3356_s29 = smov %s2545_s16  ;;  %s3357_s9 = smov %s2380_s12 }
 0x63e   :  { %26 = sbr.rel (!%p3252_p4) target bundleno = 21 (0x15), region = 127 }
 0x640   : > { %s3358_s12 = smov %s3350_s3 }
 0x645   :  { %1654 = vsyncpa [#allocation6], 1 }
 0x646   :  { %1656 = vsyncpa [#allocation6 + $0x1], 1 }
 0x647   :  { %1657 = vsyncpa [#allocation7], 1 }
 0x648   :  { %1659 = vsyncpa [#allocation7 + $0x1], 1 }
 0x649   :  { %1660 = vsyncpa [#allocation10], 1 }
 0x64a   :  { %1662 = vsyncpa [#allocation10 + $0x1], 1 }

</bundles_post_ra>
